<compile_context>
chip_gen: v5e
topology: v5e:2x2
jax: 0.10.0
libtpu: 0.0.40
codegen_flags: <defaults>
</compile_context>

<pallas_src>
import functools

import jax
import jax.numpy as jnp
import numpy as np
from jax.experimental import pallas as pl
from jax.experimental.pallas import tpu as pltpu

_LANES = 128
_TAPS_PER_WORD = 16        # conv-tap validity bits packed 16 per int32 word


# --------------------------------------------------------------------------
# host-side helpers
# --------------------------------------------------------------------------
def _mask_bits(H, W, K):
    """(n_words, H*W) int32 bitmask; bit (t % 16) of word (t // 16) is the
    validity of conv tap t under "same" zero padding in the flat-HW layout."""
    P = K // 2
    KK = K * K
    n_words = -(-KK // _TAPS_PER_WORD)
    ii, jj = np.meshgrid(np.arange(H), np.arange(W), indexing="ij")
    bits = np.zeros((n_words, H * W), np.int32)
    t = 0
    for kh in range(K):
        for kw in range(K):
            dh, dw = kh - P, kw - P
            ok = ((ii + dh >= 0) & (ii + dh < H) &
                  (jj + dw >= 0) & (jj + dw < W))
            bits[t // _TAPS_PER_WORD] |= (
                ok.reshape(-1).astype(np.int32) << (t % _TAPS_PER_WORD))
            t += 1
    return bits


def _tpu_cores_and_kind():
    try:
        kind = jax.devices()[0].device_kind.lower()
    except Exception:  # pragma: no cover - e.g. when querying fails
        kind = ""
    return (2 if "v7" in kind else 1), kind


def _pick_bt(B, C, HW, HWe, K, mm_itemsize, num_cores):
    """Batch elements folded per grid step, from a conservative VMEM budget."""
    per_b = (4 * C * HW * 4                          # x & h blocks, double-buffered
             + 2 * C * HWe * mm_itemsize             # x|h extended-image scratch
             + 2 * (2 * K * K * C) * HW * mm_itemsize  # im2col scratch (+ its load)
             + 16 * C * HW * 4)                      # conv outputs / gates (f32)
    budget = 10 * 1024 * 1024                        # headroom even on v7x (64 MiB/TC)
    bt = int(max(1, min(B, budget // max(per_b, 1))))
    # keep at least `num_cores` grid steps so CORE_PARALLEL can split them (v7x)
    while bt > 1 and -(-B // bt) < num_cores:
        bt -= 1
    while B % bt:                                    # Bt must tile the batch exactly
        bt -= 1
    return bt


# --------------------------------------------------------------------------
# kernel
# --------------------------------------------------------------------------
def make_convgru_kernel(C, H, W, K, pad, Bt, mm_dtype):
    P = K // 2
    HW = H * W
    HWe = HW + 2 * pad
    KK = K * K
    KKC = KK * C
    C2, C3 = 2 * C, 3 * C
    center = P * K + P
    offs = [(kh - P) * W + (kw - P) for kh in range(K) for kw in range(K)]

    def kernel(x_ref, h_ref, wb_ref, wr_ref, b_ref, m_ref,
               out_ref, ext_ref, patch_ref):
        bias = b_ref[...]                       # (4C, 1) f32
        bits = m_ref[...]                       # (n_words, HW) int32

        # Per-tap "same"-padding validity masks (1, HW), in the MXU operand dtype.
        masks = []
        for t in range(KK):
            if t == center:
                masks.append(None)              # centre tap is always valid
            else:
                w_i, b_i = divmod(t, _TAPS_PER_WORD)
                m = ((bits[w_i:w_i + 1, :] >> b_i) & 1)
                masks.append(m.astype(jnp.float32).astype(mm_dtype))

        # ---- stage 1: lane-extended x|h images (zero halo) + merged im2col --
        if pad:
            zero_halo = jnp.zeros((C2, pad), mm_dtype)
        for b in range(Bt):
            if pad:
                ext_ref[b, :, 0:pad] = zero_halo
                ext_ref[b, :, pad + HW:HWe] = zero_halo
            # rows [0:C]=x channels, [C:2C]=h channels  (one aligned 2C-row store)
            ext_ref[b, :, pad:pad + HW] = jnp.concatenate(
                [x_ref[b], h_ref[b]], axis=0).astype(mm_dtype)
        for b in range(Bt):
            src = ext_ref[b]                    # (2C, HWe)
            col = b * HW
            for t, off in enumerate(offs):
                win = src[:, pad + off:pad + off + HW]          # (2C, HW)
                if masks[t] is not None:
                    win = win * masks[t]
                # per-tap block of 2C rows: [x-chans | h-chans] interleaved
                patch_ref[t * C2:(t + 1) * C2, col:col + HW] = win

        # ---- stage 2: ONE fused matmul -> update / reset / out_x ------------
        conv1 = jnp.dot(wb_ref[...], patch_ref[...],
                        preferred_element_type=jnp.float32) + bias[0:C3]
        # rows: [0:C] update pre-act, [C:2C] reset pre-act, [2C:3C] out_x + b_out_x

        # ---- stage 3: gates (f32), r*h, im2col of r*h ------------------------
        zs, hs = [], []
        for b in range(Bt):
            col = b * HW
            z_b = jax.nn.sigmoid(conv1[0:C, col:col + HW])
            r_b = jax.nn.sigmoid(conv1[C:C2, col:col + HW])
            h_b = h_ref[b]                                       # (C, HW) f32
            # reuse the (already consumed) x rows of ext as the r*h image;
            # its zero halo from stage 1 is still intact.
            ext_ref[b, 0:C, pad:pad + HW] = (r_b * h_b).astype(mm_dtype)
            zs.append(z_b)
            hs.append(h_b)
        for b in range(Bt):
            src = ext_ref[b, 0:C, :]                             # (C, HWe)
            col = b * HW
            for t, off in enumerate(offs):
                win = src[:, pad + off:pad + off + HW]           # (C, HW)
                if masks[t] is not None:
                    win = win * masks[t]
                # rows [0:KKC] of the patch scratch are reused for the r*h patch
                patch_ref[t * C:(t + 1) * C, col:col + HW] = win

        # ---- stage 4: out_h(r*h) matmul + gate combine -----------------------
        conv_rh = jnp.dot(wr_ref[...], patch_ref[0:KKC, :],
                          preferred_element_type=jnp.float32) + bias[C3:]
        for b in range(Bt):
            col = b * HW
            h_mod = jnp.tanh(conv1[C2:C3, col:col + HW] + conv_rh[:, col:col + HW])
            new_h = zs[b] * hs[b] + (1.0 - zs[b]) * h_mod
            out_ref[b] = new_h.astype(out_ref.dtype)

    return kernel


# --------------------------------------------------------------------------
# wrapper
# --------------------------------------------------------------------------
@functools.partial(jax.jit, static_argnames=("kernel_size", "matmul_dtype"))
def conv_gru(x_nchw, h_nchw, w_all, b_all, *, kernel_size, matmul_dtype=None):
    """ConvGRU forward.

    x_nchw, h_nchw : (B, C, H, W) float32
    w_all          : (6, K, K, Cin, Cout) HWIO conv weights, gate order
                     0=update_x 1=update_h 2=reset_x 3=reset_h 4=out_x 5=out_h
    b_all          : (6, C) conv biases
    matmul_dtype   : dtype of the MXU operands (weights / im2col patches).
                     None -> bfloat16 (recommended on v5e/v6e/v7x).  Gate math,
                     accumulation and the output always stay float32.
    """
    B, C, H, W = x_nchw.shape
    K = kernel_size
    P = K // 2
    HW = H * W
    KKC = K * K * C
    mm_dtype = np.dtype(jnp.bfloat16 if matmul_dtype is None else matmul_dtype)

    # lane-aligned zero halo (lives only in VMEM scratch, never in HBM)
    pad = 0 if P == 0 else (-(-(P * (W + 1)) // _LANES)) * _LANES
    HWe = HW + 2 * pad

    num_cores, kind = _tpu_cores_and_kind()
    Bt = _pick_bt(B, C, HW, HWe, K, mm_dtype.itemsize, num_cores)
    grid = B // Bt

    x_flat = x_nchw.reshape(B, C, HW)
    h_flat = h_nchw.reshape(B, C, HW)

    # ---- fused / pre-transposed weight slabs (wrapper-side layout glue) ----
    # w_t[g]: (Cout, K*K*Cin) so that conv == w_t[g] @ im2col(patches)
    w_t = jnp.transpose(w_all.reshape(6, KKC, C), (0, 2, 1))
    wx = jnp.concatenate([w_t[0], w_t[2], w_t[4]], axis=0)            # (3C, KKC)
    wh = jnp.concatenate([w_t[1], w_t[3], jnp.zeros_like(w_t[5])], axis=0)
    # interleave per conv tap: columns [t*2C : t*2C+C]=x-weights, [+C : +2C]=h-weights
    w_big = jnp.stack([wx.reshape(3 * C, K * K, C),
                       wh.reshape(3 * C, K * K, C)], axis=2)
    w_big = w_big.reshape(3 * C, 2 * KKC).astype(mm_dtype)            # (3C, 2KKC)
    w_rh = w_t[5].astype(mm_dtype)                                    # (C, KKC)
    bias = jnp.concatenate([b_all[0] + b_all[1],                      # update
                            b_all[2] + b_all[3],                      # reset
                            b_all[4],                                 # out_x
                            b_all[5]])[:, None].astype(jnp.float32)   # (4C, 1)

    mask_bits = jnp.asarray(_mask_bits(H, W, K))                      # (n_words, HW)
    n_words = mask_bits.shape[0]

    if num_cores > 1 and grid >= num_cores:
        dim_sem = (pltpu.CORE_PARALLEL,)      # v7x: split batch over the 2 TCs
    else:
        dim_sem = ("parallel",)
    vmem_limit = (40 << 20) if "v7" in kind else (64 << 20)

    out_flat = pl.pallas_call(
        make_convgru_kernel(C, H, W, K, pad, Bt, mm_dtype),
        out_shape=jax.ShapeDtypeStruct((B, C, HW), x_nchw.dtype),
        grid_spec=pltpu.PrefetchScalarGridSpec(
            num_scalar_prefetch=0,
            grid=(grid,),
            in_specs=[
                pl.BlockSpec((Bt, C, HW), lambda b: (b, 0, 0)),        # x
                pl.BlockSpec((Bt, C, HW), lambda b: (b, 0, 0)),        # h
                pl.BlockSpec((3 * C, 2 * KKC), lambda b: (0, 0)),      # W_big
                pl.BlockSpec((C, KKC), lambda b: (0, 0)),              # W_rh
                pl.BlockSpec((4 * C, 1), lambda b: (0, 0)),            # bias
                pl.BlockSpec((n_words, HW), lambda b: (0, 0)),         # tap masks
            ],
            out_specs=pl.BlockSpec((Bt, C, HW), lambda b: (b, 0, 0)),
            scratch_shapes=[
                pltpu.VMEM((Bt, 2 * C, HWe), mm_dtype),   # x|h (then r*h) + zero halo
                pltpu.VMEM((2 * KKC, Bt * HW), mm_dtype),  # merged im2col patches
            ],
        ),
        compiler_params=pltpu.CompilerParams(
            dimension_semantics=dim_sem,
            vmem_limit_bytes=vmem_limit),
    )(x_flat, h_flat, w_big, w_rh, bias, mask_bits)

    return out_flat.reshape(B, C, H, W)


# --------------------------------------------------------------------------
# pure-JAX reference
# --------------------------------------------------------------------------
def _conv_ref(x_nhwc, w, b):
    y = jax.lax.conv_general_dilated(
        x_nhwc, w, window_strides=(1, 1), padding="SAME",
        dimension_numbers=("NHWC", "HWIO", "NHWC"))
    return y + b[None, None, None, :]


def conv_gru_ref(x_nchw, h_nchw, w_all, b_all):
    x = jnp.transpose(x_nchw, (0, 2, 3, 1))
    h = jnp.transpose(h_nchw, (0, 2, 3, 1))
    # gate order: 0=update_x, 1=update_h, 2=reset_x, 3=reset_h, 4=out_x, 5=out_h
    r = jax.nn.sigmoid(_conv_ref(x, w_all[2], b_all[2]) +
                       _conv_ref(h, w_all[3], b_all[3]))
    h_mod = jnp.tanh(_conv_ref(x, w_all[4], b_all[4]) +
                     _conv_ref(r * h, w_all[5], b_all[5]))
    z = jax.nn.sigmoid(_conv_ref(x, w_all[0], b_all[0]) +
                       _conv_ref(h, w_all[1], b_all[1]))
    new_h = z * h + (1.0 - z) * h_mod
    return jnp.transpose(new_h, (0, 3, 1, 2))


if __name__ == "__main__":
    B, C, H, W = 2, 4, 16, 16
    K = 3  # kernel_size

    key = jax.random.PRNGKey(0)
    k_x, k_h, k_w = jax.random.split(key, 3)

    x = jax.random.normal(k_x, (B, C, H, W), jnp.float32)
    h0 = jnp.zeros_like(x)                      # forward(x, last_hidden_state=None)
    h1 = 0.5 * jax.random.normal(k_h, (B, C, H, W), jnp.float32)

    # Conv weights HWIO (K, K, Cin, Cout); biases filled with 1.0 like __init__.
    w_all = 0.1 * jax.random.normal(k_w, (6, K, K, C, C), jnp.float32)
    b_all = jnp.ones((6, C), jnp.float32)

    # exact-precision path (f32 MXU operands) - tight tolerance
    for h_in in (h0, h1):
        ref = jax.block_until_ready(conv_gru_ref(x, h_in, w_all, b_all))
        out = jax.block_until_ready(
            conv_gru(x, h_in, w_all, b_all, kernel_size=K,
                     matmul_dtype=jnp.float32))
        np.testing.assert_allclose(np.asarray(out), np.asarray(ref),
                                   rtol=1e-4, atol=1e-5)

    # default path: bf16 MXU operands, f32 accumulation / gate math
    ref = jax.block_until_ready(conv_gru_ref(x, h1, w_all, b_all))
    out_bf16 = jax.block_until_ready(
        conv_gru(x, h1, w_all, b_all, kernel_size=K))
    np.testing.assert_allclose(np.asarray(out_bf16), np.asarray(ref),
                               rtol=5e-2, atol=5e-2)

    print("KERNEL_OK")
</pallas_src>

<mosaic_0001>
module attributes {stable_mosaic.version = 11 : i64} {
  func.func @kernel(%arg0: i32, %arg1: memref<2x4x256xf32, #tpu.memory_space<vmem>>, %arg2: memref<2x4x256xf32, #tpu.memory_space<vmem>>, %arg3: memref<12x72xf32, #tpu.memory_space<vmem>>, %arg4: memref<4x36xf32, #tpu.memory_space<vmem>>, %arg5: memref<16x1xf32, #tpu.memory_space<vmem>>, %arg6: memref<1x256xi32, #tpu.memory_space<vmem>>, %arg7: memref<2x4x256xf32, #tpu.memory_space<vmem>>, %arg8: memref<2x8x512xf32, #tpu.memory_space<vmem>>, %arg9: memref<72x512xf32, #tpu.memory_space<vmem>>) attributes {dimension_semantics = [#tpu.dimension_semantics<parallel>], iteration_bounds = array<i64: 1>, scalar_prefetch = 0 : i64, scratch_operands = 2 : i64, tpu.core_type = #tpu.core_type<tc>, window_params = [{transform_indices = @transform_0, window_bounds = array<i64: 2, 4, 256>}, {transform_indices = @transform_1, window_bounds = array<i64: 2, 4, 256>}, {pipeline_mode = #tpu.pipeline_mode<synchronous>, transform_indices = @transform_2, window_bounds = array<i64: 12, 72>}, {pipeline_mode = #tpu.pipeline_mode<synchronous>, transform_indices = @transform_3, window_bounds = array<i64: 4, 36>}, {pipeline_mode = #tpu.pipeline_mode<synchronous>, transform_indices = @transform_4, window_bounds = array<i64: 16, 1>}, {pipeline_mode = #tpu.pipeline_mode<synchronous>, transform_indices = @transform_5, window_bounds = array<i64: 1, 256>}, {transform_indices = @transform_6, window_bounds = array<i64: 2, 4, 256>}]} {
    %c0 = arith.constant 0 : index
    %c0_0 = arith.constant 0 : index
    %0 = vector.load %arg5[%c0, %c0_0] : memref<16x1xf32, #tpu.memory_space<vmem>>, vector<16x1xf32>
    %c0_1 = arith.constant 0 : index
    %c0_2 = arith.constant 0 : index
    %1 = vector.load %arg6[%c0_1, %c0_2] : memref<1x256xi32, #tpu.memory_space<vmem>>, vector<1x256xi32>
    %c0_i32 = arith.constant 0 : i32
    %2 = vector.broadcast %c0_i32 : i32 to vector<1x256xi32>
    %3 = arith.shrsi %1, %2 : vector<1x256xi32>
    %c1_i32 = arith.constant 1 : i32
    %4 = vector.broadcast %c1_i32 : i32 to vector<1x256xi32>
    %5 = arith.andi %3, %4 : vector<1x256xi32>
    %6 = arith.sitofp %5 : vector<1x256xi32> to vector<1x256xf32>
    %c1_i32_3 = arith.constant 1 : i32
    %7 = vector.broadcast %c1_i32_3 : i32 to vector<1x256xi32>
    %8 = arith.shrsi %1, %7 : vector<1x256xi32>
    %c1_i32_4 = arith.constant 1 : i32
    %9 = vector.broadcast %c1_i32_4 : i32 to vector<1x256xi32>
    %10 = arith.andi %8, %9 : vector<1x256xi32>
    %11 = arith.sitofp %10 : vector<1x256xi32> to vector<1x256xf32>
    %c2_i32 = arith.constant 2 : i32
    %12 = vector.broadcast %c2_i32 : i32 to vector<1x256xi32>
    %13 = arith.shrsi %1, %12 : vector<1x256xi32>
    %c1_i32_5 = arith.constant 1 : i32
    %14 = vector.broadcast %c1_i32_5 : i32 to vector<1x256xi32>
    %15 = arith.andi %13, %14 : vector<1x256xi32>
    %16 = arith.sitofp %15 : vector<1x256xi32> to vector<1x256xf32>
    %c3_i32 = arith.constant 3 : i32
    %17 = vector.broadcast %c3_i32 : i32 to vector<1x256xi32>
    %18 = arith.shrsi %1, %17 : vector<1x256xi32>
    %c1_i32_6 = arith.constant 1 : i32
    %19 = vector.broadcast %c1_i32_6 : i32 to vector<1x256xi32>
    %20 = arith.andi %18, %19 : vector<1x256xi32>
    %21 = arith.sitofp %20 : vector<1x256xi32> to vector<1x256xf32>
    %c5_i32 = arith.constant 5 : i32
    %22 = vector.broadcast %c5_i32 : i32 to vector<1x256xi32>
    %23 = arith.shrsi %1, %22 : vector<1x256xi32>
    %c1_i32_7 = arith.constant 1 : i32
    %24 = vector.broadcast %c1_i32_7 : i32 to vector<1x256xi32>
    %25 = arith.andi %23, %24 : vector<1x256xi32>
    %26 = arith.sitofp %25 : vector<1x256xi32> to vector<1x256xf32>
    %c6_i32 = arith.constant 6 : i32
    %27 = vector.broadcast %c6_i32 : i32 to vector<1x256xi32>
    %28 = arith.shrsi %1, %27 : vector<1x256xi32>
    %c1_i32_8 = arith.constant 1 : i32
    %29 = vector.broadcast %c1_i32_8 : i32 to vector<1x256xi32>
    %30 = arith.andi %28, %29 : vector<1x256xi32>
    %31 = arith.sitofp %30 : vector<1x256xi32> to vector<1x256xf32>
    %c7_i32 = arith.constant 7 : i32
    %32 = vector.broadcast %c7_i32 : i32 to vector<1x256xi32>
    %33 = arith.shrsi %1, %32 : vector<1x256xi32>
    %c1_i32_9 = arith.constant 1 : i32
    %34 = vector.broadcast %c1_i32_9 : i32 to vector<1x256xi32>
    %35 = arith.andi %33, %34 : vector<1x256xi32>
    %36 = arith.sitofp %35 : vector<1x256xi32> to vector<1x256xf32>
    %c8_i32 = arith.constant 8 : i32
    %37 = vector.broadcast %c8_i32 : i32 to vector<1x256xi32>
    %38 = arith.shrsi %1, %37 : vector<1x256xi32>
    %c1_i32_10 = arith.constant 1 : i32
    %39 = vector.broadcast %c1_i32_10 : i32 to vector<1x256xi32>
    %40 = arith.andi %38, %39 : vector<1x256xi32>
    %41 = arith.sitofp %40 : vector<1x256xi32> to vector<1x256xf32>
    %cst = arith.constant 0.000000e+00 : f32
    %42 = vector.broadcast %cst : f32 to vector<8x128xf32>
    %c0_11 = arith.constant 0 : index
    %c0_12 = arith.constant 0 : index
    %c0_13 = arith.constant 0 : index
    %43 = vector.load %arg8[%c0_11, %c0_12, %c0_13] : memref<2x8x512xf32, #tpu.memory_space<vmem>>, vector<1x8x128xf32>
    %44 = vector.shape_cast %43 : vector<1x8x128xf32> to vector<8x128xf32>
    %45 = vector.shape_cast %42 : vector<8x128xf32> to vector<1x8x128xf32>
    tpu.vector_store %arg8[%c0_11, %c0_12, %c0_13], %45 {strides = array<i32>} : memref<2x8x512xf32, #tpu.memory_space<vmem>>, vector<1x8x128xf32>,
    %c0_14 = arith.constant 0 : index
    %c0_15 = arith.constant 0 : index
    %c384 = arith.constant 384 : index
    %46 = vector.load %arg8[%c0_14, %c0_15, %c384] : memref<2x8x512xf32, #tpu.memory_space<vmem>>, vector<1x8x128xf32>
    %47 = vector.shape_cast %46 : vector<1x8x128xf32> to vector<8x128xf32>
    %48 = vector.shape_cast %42 : vector<8x128xf32> to vector<1x8x128xf32>
    tpu.vector_store %arg8[%c0_14, %c0_15, %c384], %48 {strides = array<i32>} : memref<2x8x512xf32, #tpu.memory_space<vmem>>, vector<1x8x128xf32>,
    %c0_16 = arith.constant 0 : index
    %c0_17 = arith.constant 0 : index
    %c0_18 = arith.constant 0 : index
    %49 = vector.load %arg1[%c0_16, %c0_17, %c0_18] : memref<2x4x256xf32, #tpu.memory_space<vmem>>, vector<1x4x256xf32>
    %50 = vector.shape_cast %49 : vector<1x4x256xf32> to vector<4x256xf32>
    %c0_19 = arith.constant 0 : index
    %c0_20 = arith.constant 0 : index
    %c0_21 = arith.constant 0 : index
    %51 = vector.load %arg2[%c0_19, %c0_20, %c0_21] : memref<2x4x256xf32, #tpu.memory_space<vmem>>, vector<1x4x256xf32>
    %52 = vector.shape_cast %51 : vector<1x4x256xf32> to vector<4x256xf32>
    %53 = tpu.concatenate %50, %52 in 0 : vector<4x256xf32>, vector<4x256xf32> -> vector<8x256xf32>
    %c0_22 = arith.constant 0 : index
    %c0_23 = arith.constant 0 : index
    %c128 = arith.constant 128 : index
    %54 = vector.load %arg8[%c0_22, %c0_23, %c128] : memref<2x8x512xf32, #tpu.memory_space<vmem>>, vector<1x8x256xf32>
    %55 = vector.shape_cast %54 : vector<1x8x256xf32> to vector<8x256xf32>
    %56 = vector.shape_cast %53 : vector<8x256xf32> to vector<1x8x256xf32>
    tpu.vector_store %arg8[%c0_22, %c0_23, %c128], %56 {strides = array<i32>} : memref<2x8x512xf32, #tpu.memory_space<vmem>>, vector<1x8x256xf32>,
    %c1 = arith.constant 1 : index
    %c0_24 = arith.constant 0 : index
    %c0_25 = arith.constant 0 : index
    %57 = vector.load %arg8[%c1, %c0_24, %c0_25] : memref<2x8x512xf32, #tpu.memory_space<vmem>>, vector<1x8x128xf32>
    %58 = vector.shape_cast %57 : vector<1x8x128xf32> to vector<8x128xf32>
    %59 = vector.shape_cast %42 : vector<8x128xf32> to vector<1x8x128xf32>
    tpu.vector_store %arg8[%c1, %c0_24, %c0_25], %59 {strides = array<i32>} : memref<2x8x512xf32, #tpu.memory_space<vmem>>, vector<1x8x128xf32>,
    %c1_26 = arith.constant 1 : index
    %c0_27 = arith.constant 0 : index
    %c384_28 = arith.constant 384 : index
    %60 = vector.load %arg8[%c1_26, %c0_27, %c384_28] : memref<2x8x512xf32, #tpu.memory_space<vmem>>, vector<1x8x128xf32>
    %61 = vector.shape_cast %60 : vector<1x8x128xf32> to vector<8x128xf32>
    %62 = vector.shape_cast %42 : vector<8x128xf32> to vector<1x8x128xf32>
    tpu.vector_store %arg8[%c1_26, %c0_27, %c384_28], %62 {strides = array<i32>} : memref<2x8x512xf32, #tpu.memory_space<vmem>>, vector<1x8x128xf32>,
    %c1_29 = arith.constant 1 : index
    %c0_30 = arith.constant 0 : index
    %c0_31 = arith.constant 0 : index
    %63 = vector.load %arg1[%c1_29, %c0_30, %c0_31] : memref<2x4x256xf32, #tpu.memory_space<vmem>>, vector<1x4x256xf32>
    %64 = vector.shape_cast %63 : vector<1x4x256xf32> to vector<4x256xf32>
    %c1_32 = arith.constant 1 : index
    %c0_33 = arith.constant 0 : index
    %c0_34 = arith.constant 0 : index
    %65 = vector.load %arg2[%c1_32, %c0_33, %c0_34] : memref<2x4x256xf32, #tpu.memory_space<vmem>>, vector<1x4x256xf32>
    %66 = vector.shape_cast %65 : vector<1x4x256xf32> to vector<4x256xf32>
    %67 = tpu.concatenate %64, %66 in 0 : vector<4x256xf32>, vector<4x256xf32> -> vector<8x256xf32>
    %c1_35 = arith.constant 1 : index
    %c0_36 = arith.constant 0 : index
    %c128_37 = arith.constant 128 : index
    %68 = vector.load %arg8[%c1_35, %c0_36, %c128_37] : memref<2x8x512xf32, #tpu.memory_space<vmem>>, vector<1x8x256xf32>
    %69 = vector.shape_cast %68 : vector<1x8x256xf32> to vector<8x256xf32>
    %70 = vector.shape_cast %67 : vector<8x256xf32> to vector<1x8x256xf32>
    tpu.vector_store %arg8[%c1_35, %c0_36, %c128_37], %70 {strides = array<i32>} : memref<2x8x512xf32, #tpu.memory_space<vmem>>, vector<1x8x256xf32>,
    %c0_38 = arith.constant 0 : index
    %c0_39 = arith.constant 0 : index
    %c0_40 = arith.constant 0 : index
    %71 = vector.load %arg8[%c0_38, %c0_39, %c0_40] : memref<2x8x512xf32, #tpu.memory_space<vmem>>, vector<1x8x512xf32>
    %72 = vector.shape_cast %71 : vector<1x8x512xf32> to vector<8x512xf32>
    %73 = vector.extract_strided_slice %72 {offsets = [0, 111], sizes = [8, 256], strides = [1, 1]} : vector<8x512xf32> to vector<8x256xf32>
    %74 = vector.broadcast %6 : vector<1x256xf32> to vector<8x256xf32>
    %75 = arith.mulf %73, %74 : vector<8x256xf32>
    %c0_41 = arith.constant 0 : index
    %c0_42 = arith.constant 0 : index
    %76 = vector.load %arg9[%c0_41, %c0_42] : memref<72x512xf32, #tpu.memory_space<vmem>>, vector<8x256xf32>
    tpu.vector_store %arg9[%c0_41, %c0_42], %75 {strides = array<i32>} : memref<72x512xf32, #tpu.memory_space<vmem>>, vector<8x256xf32>,
    %77 = vector.extract_strided_slice %72 {offsets = [0, 112], sizes = [8, 256], strides = [1, 1]} : vector<8x512xf32> to vector<8x256xf32>
    %78 = vector.broadcast %11 : vector<1x256xf32> to vector<8x256xf32>
    %79 = arith.mulf %77, %78 : vector<8x256xf32>
    %c8 = arith.constant 8 : index
    %c0_43 = arith.constant 0 : index
    %80 = vector.load %arg9[%c8, %c0_43] : memref<72x512xf32, #tpu.memory_space<vmem>>, vector<8x256xf32>
    tpu.vector_store %arg9[%c8, %c0_43], %79 {strides = array<i32>} : memref<72x512xf32, #tpu.memory_space<vmem>>, vector<8x256xf32>,
    %81 = vector.extract_strided_slice %72 {offsets = [0, 113], sizes = [8, 256], strides = [1, 1]} : vector<8x512xf32> to vector<8x256xf32>
    %82 = vector.broadcast %16 : vector<1x256xf32> to vector<8x256xf32>
    %83 = arith.mulf %81, %82 : vector<8x256xf32>
    %c16 = arith.constant 16 : index
    %c0_44 = arith.constant 0 : index
    %84 = vector.load %arg9[%c16, %c0_44] : memref<72x512xf32, #tpu.memory_space<vmem>>, vector<8x256xf32>
    tpu.vector_store %arg9[%c16, %c0_44], %83 {strides = array<i32>} : memref<72x512xf32, #tpu.memory_space<vmem>>, vector<8x256xf32>,
    %85 = vector.extract_strided_slice %72 {offsets = [0, 127], sizes = [8, 256], strides = [1, 1]} : vector<8x512xf32> to vector<8x256xf32>
    %86 = vector.broadcast %21 : vector<1x256xf32> to vector<8x256xf32>
    %87 = arith.mulf %85, %86 : vector<8x256xf32>
    %c24 = arith.constant 24 : index
    %c0_45 = arith.constant 0 : index
    %88 = vector.load %arg9[%c24, %c0_45] : memref<72x512xf32, #tpu.memory_space<vmem>>, vector<8x256xf32>
    tpu.vector_store %arg9[%c24, %c0_45], %87 {strides = array<i32>} : memref<72x512xf32, #tpu.memory_space<vmem>>, vector<8x256xf32>,
    %89 = vector.extract_strided_slice %72 {offsets = [0, 128], sizes = [8, 256], strides = [1, 1]} : vector<8x512xf32> to vector<8x256xf32>
    %c32 = arith.constant 32 : index
    %c0_46 = arith.constant 0 : index
    %90 = vector.load %arg9[%c32, %c0_46] : memref<72x512xf32, #tpu.memory_space<vmem>>, vector<8x256xf32>
    tpu.vector_store %arg9[%c32, %c0_46], %89 {strides = array<i32>} : memref<72x512xf32, #tpu.memory_space<vmem>>, vector<8x256xf32>,
    %91 = vector.extract_strided_slice %72 {offsets = [0, 129], sizes = [8, 256], strides = [1, 1]} : vector<8x512xf32> to vector<8x256xf32>
    %92 = vector.broadcast %26 : vector<1x256xf32> to vector<8x256xf32>
    %93 = arith.mulf %91, %92 : vector<8x256xf32>
    %c40 = arith.constant 40 : index
    %c0_47 = arith.constant 0 : index
    %94 = vector.load %arg9[%c40, %c0_47] : memref<72x512xf32, #tpu.memory_space<vmem>>, vector<8x256xf32>
    tpu.vector_store %arg9[%c40, %c0_47], %93 {strides = array<i32>} : memref<72x512xf32, #tpu.memory_space<vmem>>, vector<8x256xf32>,
    %95 = vector.extract_strided_slice %72 {offsets = [0, 143], sizes = [8, 256], strides = [1, 1]} : vector<8x512xf32> to vector<8x256xf32>
    %96 = vector.broadcast %31 : vector<1x256xf32> to vector<8x256xf32>
    %97 = arith.mulf %95, %96 : vector<8x256xf32>
    %c48 = arith.constant 48 : index
    %c0_48 = arith.constant 0 : index
    %98 = vector.load %arg9[%c48, %c0_48] : memref<72x512xf32, #tpu.memory_space<vmem>>, vector<8x256xf32>
    tpu.vector_store %arg9[%c48, %c0_48], %97 {strides = array<i32>} : memref<72x512xf32, #tpu.memory_space<vmem>>, vector<8x256xf32>,
    %99 = vector.extract_strided_slice %72 {offsets = [0, 144], sizes = [8, 256], strides = [1, 1]} : vector<8x512xf32> to vector<8x256xf32>
    %100 = vector.broadcast %36 : vector<1x256xf32> to vector<8x256xf32>
    %101 = arith.mulf %99, %100 : vector<8x256xf32>
    %c56 = arith.constant 56 : index
    %c0_49 = arith.constant 0 : index
    %102 = vector.load %arg9[%c56, %c0_49] : memref<72x512xf32, #tpu.memory_space<vmem>>, vector<8x256xf32>
    tpu.vector_store %arg9[%c56, %c0_49], %101 {strides = array<i32>} : memref<72x512xf32, #tpu.memory_space<vmem>>, vector<8x256xf32>,
    %103 = vector.extract_strided_slice %72 {offsets = [0, 145], sizes = [8, 256], strides = [1, 1]} : vector<8x512xf32> to vector<8x256xf32>
    %104 = vector.broadcast %41 : vector<1x256xf32> to vector<8x256xf32>
    %105 = arith.mulf %103, %104 : vector<8x256xf32>
    %c64 = arith.constant 64 : index
    %c0_50 = arith.constant 0 : index
    %106 = vector.load %arg9[%c64, %c0_50] : memref<72x512xf32, #tpu.memory_space<vmem>>, vector<8x256xf32>
    tpu.vector_store %arg9[%c64, %c0_50], %105 {strides = array<i32>} : memref<72x512xf32, #tpu.memory_space<vmem>>, vector<8x256xf32>,
    %c1_51 = arith.constant 1 : index
    %c0_52 = arith.constant 0 : index
    %c0_53 = arith.constant 0 : index
    %107 = vector.load %arg8[%c1_51, %c0_52, %c0_53] : memref<2x8x512xf32, #tpu.memory_space<vmem>>, vector<1x8x512xf32>
    %108 = vector.shape_cast %107 : vector<1x8x512xf32> to vector<8x512xf32>
    %109 = vector.extract_strided_slice %108 {offsets = [0, 111], sizes = [8, 256], strides = [1, 1]} : vector<8x512xf32> to vector<8x256xf32>
    %110 = vector.broadcast %6 : vector<1x256xf32> to vector<8x256xf32>
    %111 = arith.mulf %109, %110 : vector<8x256xf32>
    %c0_54 = arith.constant 0 : index
    %c256 = arith.constant 256 : index
    %112 = vector.load %arg9[%c0_54, %c256] : memref<72x512xf32, #tpu.memory_space<vmem>>, vector<8x256xf32>
    tpu.vector_store %arg9[%c0_54, %c256], %111 {strides = array<i32>} : memref<72x512xf32, #tpu.memory_space<vmem>>, vector<8x256xf32>,
    %113 = vector.extract_strided_slice %108 {offsets = [0, 112], sizes = [8, 256], strides = [1, 1]} : vector<8x512xf32> to vector<8x256xf32>
    %114 = vector.broadcast %11 : vector<1x256xf32> to vector<8x256xf32>
    %115 = arith.mulf %113, %114 : vector<8x256xf32>
    %c8_55 = arith.constant 8 : index
    %c256_56 = arith.constant 256 : index
    %116 = vector.load %arg9[%c8_55, %c256_56] : memref<72x512xf32, #tpu.memory_space<vmem>>, vector<8x256xf32>
    tpu.vector_store %arg9[%c8_55, %c256_56], %115 {strides = array<i32>} : memref<72x512xf32, #tpu.memory_space<vmem>>, vector<8x256xf32>,
    %117 = vector.extract_strided_slice %108 {offsets = [0, 113], sizes = [8, 256], strides = [1, 1]} : vector<8x512xf32> to vector<8x256xf32>
    %118 = vector.broadcast %16 : vector<1x256xf32> to vector<8x256xf32>
    %119 = arith.mulf %117, %118 : vector<8x256xf32>
    %c16_57 = arith.constant 16 : index
    %c256_58 = arith.constant 256 : index
    %120 = vector.load %arg9[%c16_57, %c256_58] : memref<72x512xf32, #tpu.memory_space<vmem>>, vector<8x256xf32>
    tpu.vector_store %arg9[%c16_57, %c256_58], %119 {strides = array<i32>} : memref<72x512xf32, #tpu.memory_space<vmem>>, vector<8x256xf32>,
    %121 = vector.extract_strided_slice %108 {offsets = [0, 127], sizes = [8, 256], strides = [1, 1]} : vector<8x512xf32> to vector<8x256xf32>
    %122 = vector.broadcast %21 : vector<1x256xf32> to vector<8x256xf32>
    %123 = arith.mulf %121, %122 : vector<8x256xf32>
    %c24_59 = arith.constant 24 : index
    %c256_60 = arith.constant 256 : index
    %124 = vector.load %arg9[%c24_59, %c256_60] : memref<72x512xf32, #tpu.memory_space<vmem>>, vector<8x256xf32>
    tpu.vector_store %arg9[%c24_59, %c256_60], %123 {strides = array<i32>} : memref<72x512xf32, #tpu.memory_space<vmem>>, vector<8x256xf32>,
    %125 = vector.extract_strided_slice %108 {offsets = [0, 128], sizes = [8, 256], strides = [1, 1]} : vector<8x512xf32> to vector<8x256xf32>
    %c32_61 = arith.constant 32 : index
    %c256_62 = arith.constant 256 : index
    %126 = vector.load %arg9[%c32_61, %c256_62] : memref<72x512xf32, #tpu.memory_space<vmem>>, vector<8x256xf32>
    tpu.vector_store %arg9[%c32_61, %c256_62], %125 {strides = array<i32>} : memref<72x512xf32, #tpu.memory_space<vmem>>, vector<8x256xf32>,
    %127 = vector.extract_strided_slice %108 {offsets = [0, 129], sizes = [8, 256], strides = [1, 1]} : vector<8x512xf32> to vector<8x256xf32>
    %128 = vector.broadcast %26 : vector<1x256xf32> to vector<8x256xf32>
    %129 = arith.mulf %127, %128 : vector<8x256xf32>
    %c40_63 = arith.constant 40 : index
    %c256_64 = arith.constant 256 : index
    %130 = vector.load %arg9[%c40_63, %c256_64] : memref<72x512xf32, #tpu.memory_space<vmem>>, vector<8x256xf32>
    tpu.vector_store %arg9[%c40_63, %c256_64], %129 {strides = array<i32>} : memref<72x512xf32, #tpu.memory_space<vmem>>, vector<8x256xf32>,
    %131 = vector.extract_strided_slice %108 {offsets = [0, 143], sizes = [8, 256], strides = [1, 1]} : vector<8x512xf32> to vector<8x256xf32>
    %132 = vector.broadcast %31 : vector<1x256xf32> to vector<8x256xf32>
    %133 = arith.mulf %131, %132 : vector<8x256xf32>
    %c48_65 = arith.constant 48 : index
    %c256_66 = arith.constant 256 : index
    %134 = vector.load %arg9[%c48_65, %c256_66] : memref<72x512xf32, #tpu.memory_space<vmem>>, vector<8x256xf32>
    tpu.vector_store %arg9[%c48_65, %c256_66], %133 {strides = array<i32>} : memref<72x512xf32, #tpu.memory_space<vmem>>, vector<8x256xf32>,
    %135 = vector.extract_strided_slice %108 {offsets = [0, 144], sizes = [8, 256], strides = [1, 1]} : vector<8x512xf32> to vector<8x256xf32>
    %136 = vector.broadcast %36 : vector<1x256xf32> to vector<8x256xf32>
    %137 = arith.mulf %135, %136 : vector<8x256xf32>
    %c56_67 = arith.constant 56 : index
    %c256_68 = arith.constant 256 : index
    %138 = vector.load %arg9[%c56_67, %c256_68] : memref<72x512xf32, #tpu.memory_space<vmem>>, vector<8x256xf32>
    tpu.vector_store %arg9[%c56_67, %c256_68], %137 {strides = array<i32>} : memref<72x512xf32, #tpu.memory_space<vmem>>, vector<8x256xf32>,
    %139 = vector.extract_strided_slice %108 {offsets = [0, 145], sizes = [8, 256], strides = [1, 1]} : vector<8x512xf32> to vector<8x256xf32>
    %140 = vector.broadcast %41 : vector<1x256xf32> to vector<8x256xf32>
    %141 = arith.mulf %139, %140 : vector<8x256xf32>
    %c64_69 = arith.constant 64 : index
    %c256_70 = arith.constant 256 : index
    %142 = vector.load %arg9[%c64_69, %c256_70] : memref<72x512xf32, #tpu.memory_space<vmem>>, vector<8x256xf32>
    tpu.vector_store %arg9[%c64_69, %c256_70], %141 {strides = array<i32>} : memref<72x512xf32, #tpu.memory_space<vmem>>, vector<8x256xf32>,
    %c0_71 = arith.constant 0 : index
    %c0_72 = arith.constant 0 : index
    %143 = vector.load %arg3[%c0_71, %c0_72] : memref<12x72xf32, #tpu.memory_space<vmem>>, vector<12x72xf32>
    %c0_73 = arith.constant 0 : index
    %c0_74 = arith.constant 0 : index
    %144 = vector.load %arg9[%c0_73, %c0_74] : memref<72x512xf32, #tpu.memory_space<vmem>>, vector<72x512xf32>
    %cst_75 = arith.constant dense<0.000000e+00> : vector<12x512xf32>
    %145 = tpu.matmul %143, %144, %cst_75 {dimension_numbers = #tpu.dot_dimension_numbers<[1], [0], [0], [1], [0, 0, 1, 1], [], []>} : vector<12x72xf32>, vector<72x512xf32>, vector<12x512xf32> -> vector<12x512xf32>
    %146 = vector.extract_strided_slice %0 {offsets = [0, 0], sizes = [12, 1], strides = [1, 1]} : vector<16x1xf32> to vector<12x1xf32>
    %147 = vector.broadcast %146 : vector<12x1xf32> to vector<12x512xf32>
    %148 = arith.addf %145, %147 : vector<12x512xf32>
    %149 = vector.extract_strided_slice %148 {offsets = [0, 0], sizes = [4, 256], strides = [1, 1]} : vector<12x512xf32> to vector<4x256xf32>
    %150 = arith.negf %149 : vector<4x256xf32>
    %151 = math.exp %150 : vector<4x256xf32>
    %cst_76 = arith.constant 1.000000e+00 : f32
    %152 = vector.broadcast %cst_76 : f32 to vector<4x256xf32>
    %153 = arith.addf %152, %151 : vector<4x256xf32>
    %154 = arith.divf %152, %153 : vector<4x256xf32>
    %155 = vector.extract_strided_slice %148 {offsets = [4, 0], sizes = [4, 256], strides = [1, 1]} : vector<12x512xf32> to vector<4x256xf32>
    %156 = arith.negf %155 : vector<4x256xf32>
    %157 = math.exp %156 : vector<4x256xf32>
    %cst_77 = arith.constant 1.000000e+00 : f32
    %158 = vector.broadcast %cst_77 : f32 to vector<4x256xf32>
    %159 = arith.addf %158, %157 : vector<4x256xf32>
    %160 = arith.divf %158, %159 : vector<4x256xf32>
    %c0_78 = arith.constant 0 : index
    %c0_79 = arith.constant 0 : index
    %c0_80 = arith.constant 0 : index
    %161 = vector.load %arg2[%c0_78, %c0_79, %c0_80] : memref<2x4x256xf32, #tpu.memory_space<vmem>>, vector<1x4x256xf32>
    %162 = vector.shape_cast %161 : vector<1x4x256xf32> to vector<4x256xf32>
    %163 = arith.mulf %160, %162 : vector<4x256xf32>
    %c0_81 = arith.constant 0 : index
    %c0_82 = arith.constant 0 : index
    %c128_83 = arith.constant 128 : index
    %164 = vector.load %arg8[%c0_81, %c0_82, %c128_83] : memref<2x8x512xf32, #tpu.memory_space<vmem>>, vector<1x4x256xf32>
    %165 = vector.shape_cast %164 : vector<1x4x256xf32> to vector<4x256xf32>
    %166 = vector.shape_cast %163 : vector<4x256xf32> to vector<1x4x256xf32>
    tpu.vector_store %arg8[%c0_81, %c0_82, %c128_83], %166 {strides = array<i32>} : memref<2x8x512xf32, #tpu.memory_space<vmem>>, vector<1x4x256xf32>,
    %167 = vector.extract_strided_slice %148 {offsets = [0, 256], sizes = [4, 256], strides = [1, 1]} : vector<12x512xf32> to vector<4x256xf32>
    %168 = arith.negf %167 : vector<4x256xf32>
    %169 = math.exp %168 : vector<4x256xf32>
    %cst_84 = arith.constant 1.000000e+00 : f32
    %170 = vector.broadcast %cst_84 : f32 to vector<4x256xf32>
    %171 = arith.addf %170, %169 : vector<4x256xf32>
    %172 = arith.divf %170, %171 : vector<4x256xf32>
    %173 = vector.extract_strided_slice %148 {offsets = [4, 256], sizes = [4, 256], strides = [1, 1]} : vector<12x512xf32> to vector<4x256xf32>
    %174 = arith.negf %173 : vector<4x256xf32>
    %175 = math.exp %174 : vector<4x256xf32>
    %cst_85 = arith.constant 1.000000e+00 : f32
    %176 = vector.broadcast %cst_85 : f32 to vector<4x256xf32>
    %177 = arith.addf %176, %175 : vector<4x256xf32>
    %178 = arith.divf %176, %177 : vector<4x256xf32>
    %c1_86 = arith.constant 1 : index
    %c0_87 = arith.constant 0 : index
    %c0_88 = arith.constant 0 : index
    %179 = vector.load %arg2[%c1_86, %c0_87, %c0_88] : memref<2x4x256xf32, #tpu.memory_space<vmem>>, vector<1x4x256xf32>
    %180 = vector.shape_cast %179 : vector<1x4x256xf32> to vector<4x256xf32>
    %181 = arith.mulf %178, %180 : vector<4x256xf32>
    %c1_89 = arith.constant 1 : index
    %c0_90 = arith.constant 0 : index
    %c128_91 = arith.constant 128 : index
    %182 = vector.load %arg8[%c1_89, %c0_90, %c128_91] : memref<2x8x512xf32, #tpu.memory_space<vmem>>, vector<1x4x256xf32>
    %183 = vector.shape_cast %182 : vector<1x4x256xf32> to vector<4x256xf32>
    %184 = vector.shape_cast %181 : vector<4x256xf32> to vector<1x4x256xf32>
    tpu.vector_store %arg8[%c1_89, %c0_90, %c128_91], %184 {strides = array<i32>} : memref<2x8x512xf32, #tpu.memory_space<vmem>>, vector<1x4x256xf32>,
    %c0_92 = arith.constant 0 : index
    %c0_93 = arith.constant 0 : index
    %c0_94 = arith.constant 0 : index
    %185 = vector.load %arg8[%c0_92, %c0_93, %c0_94] : memref<2x8x512xf32, #tpu.memory_space<vmem>>, vector<1x4x512xf32>
    %186 = vector.shape_cast %185 : vector<1x4x512xf32> to vector<4x512xf32>
    %187 = vector.extract_strided_slice %186 {offsets = [0, 111], sizes = [4, 256], strides = [1, 1]} : vector<4x512xf32> to vector<4x256xf32>
    %188 = vector.broadcast %6 : vector<1x256xf32> to vector<4x256xf32>
    %189 = arith.mulf %187, %188 : vector<4x256xf32>
    %c0_95 = arith.constant 0 : index
    %c0_96 = arith.constant 0 : index
    %190 = vector.load %arg9[%c0_95, %c0_96] : memref<72x512xf32, #tpu.memory_space<vmem>>, vector<4x256xf32>
    tpu.vector_store %arg9[%c0_95, %c0_96], %189 {strides = array<i32>} : memref<72x512xf32, #tpu.memory_space<vmem>>, vector<4x256xf32>,
    %191 = vector.extract_strided_slice %186 {offsets = [0, 112], sizes = [4, 256], strides = [1, 1]} : vector<4x512xf32> to vector<4x256xf32>
    %192 = vector.broadcast %11 : vector<1x256xf32> to vector<4x256xf32>
    %193 = arith.mulf %191, %192 : vector<4x256xf32>
    %c4 = arith.constant 4 : index
    %c0_97 = arith.constant 0 : index
    %194 = vector.load %arg9[%c4, %c0_97] : memref<72x512xf32, #tpu.memory_space<vmem>>, vector<4x256xf32>
    tpu.vector_store %arg9[%c4, %c0_97], %193 {strides = array<i32>} : memref<72x512xf32, #tpu.memory_space<vmem>>, vector<4x256xf32>,
    %195 = vector.extract_strided_slice %186 {offsets = [0, 113], sizes = [4, 256], strides = [1, 1]} : vector<4x512xf32> to vector<4x256xf32>
    %196 = vector.broadcast %16 : vector<1x256xf32> to vector<4x256xf32>
    %197 = arith.mulf %195, %196 : vector<4x256xf32>
    %c8_98 = arith.constant 8 : index
    %c0_99 = arith.constant 0 : index
    %198 = vector.load %arg9[%c8_98, %c0_99] : memref<72x512xf32, #tpu.memory_space<vmem>>, vector<4x256xf32>
    tpu.vector_store %arg9[%c8_98, %c0_99], %197 {strides = array<i32>} : memref<72x512xf32, #tpu.memory_space<vmem>>, vector<4x256xf32>,
    %199 = vector.extract_strided_slice %186 {offsets = [0, 127], sizes = [4, 256], strides = [1, 1]} : vector<4x512xf32> to vector<4x256xf32>
    %200 = vector.broadcast %21 : vector<1x256xf32> to vector<4x256xf32>
    %201 = arith.mulf %199, %200 : vector<4x256xf32>
    %c12 = arith.constant 12 : index
    %c0_100 = arith.constant 0 : index
    %202 = vector.load %arg9[%c12, %c0_100] : memref<72x512xf32, #tpu.memory_space<vmem>>, vector<4x256xf32>
    tpu.vector_store %arg9[%c12, %c0_100], %201 {strides = array<i32>} : memref<72x512xf32, #tpu.memory_space<vmem>>, vector<4x256xf32>,
    %203 = vector.extract_strided_slice %186 {offsets = [0, 128], sizes = [4, 256], strides = [1, 1]} : vector<4x512xf32> to vector<4x256xf32>
    %c16_101 = arith.constant 16 : index
    %c0_102 = arith.constant 0 : index
    %204 = vector.load %arg9[%c16_101, %c0_102] : memref<72x512xf32, #tpu.memory_space<vmem>>, vector<4x256xf32>
    tpu.vector_store %arg9[%c16_101, %c0_102], %203 {strides = array<i32>} : memref<72x512xf32, #tpu.memory_space<vmem>>, vector<4x256xf32>,
    %205 = vector.extract_strided_slice %186 {offsets = [0, 129], sizes = [4, 256], strides = [1, 1]} : vector<4x512xf32> to vector<4x256xf32>
    %206 = vector.broadcast %26 : vector<1x256xf32> to vector<4x256xf32>
    %207 = arith.mulf %205, %206 : vector<4x256xf32>
    %c20 = arith.constant 20 : index
    %c0_103 = arith.constant 0 : index
    %208 = vector.load %arg9[%c20, %c0_103] : memref<72x512xf32, #tpu.memory_space<vmem>>, vector<4x256xf32>
    tpu.vector_store %arg9[%c20, %c0_103], %207 {strides = array<i32>} : memref<72x512xf32, #tpu.memory_space<vmem>>, vector<4x256xf32>,
    %209 = vector.extract_strided_slice %186 {offsets = [0, 143], sizes = [4, 256], strides = [1, 1]} : vector<4x512xf32> to vector<4x256xf32>
    %210 = vector.broadcast %31 : vector<1x256xf32> to vector<4x256xf32>
    %211 = arith.mulf %209, %210 : vector<4x256xf32>
    %c24_104 = arith.constant 24 : index
    %c0_105 = arith.constant 0 : index
    %212 = vector.load %arg9[%c24_104, %c0_105] : memref<72x512xf32, #tpu.memory_space<vmem>>, vector<4x256xf32>
    tpu.vector_store %arg9[%c24_104, %c0_105], %211 {strides = array<i32>} : memref<72x512xf32, #tpu.memory_space<vmem>>, vector<4x256xf32>,
    %213 = vector.extract_strided_slice %186 {offsets = [0, 144], sizes = [4, 256], strides = [1, 1]} : vector<4x512xf32> to vector<4x256xf32>
    %214 = vector.broadcast %36 : vector<1x256xf32> to vector<4x256xf32>
    %215 = arith.mulf %213, %214 : vector<4x256xf32>
    %c28 = arith.constant 28 : index
    %c0_106 = arith.constant 0 : index
    %216 = vector.load %arg9[%c28, %c0_106] : memref<72x512xf32, #tpu.memory_space<vmem>>, vector<4x256xf32>
    tpu.vector_store %arg9[%c28, %c0_106], %215 {strides = array<i32>} : memref<72x512xf32, #tpu.memory_space<vmem>>, vector<4x256xf32>,
    %217 = vector.extract_strided_slice %186 {offsets = [0, 145], sizes = [4, 256], strides = [1, 1]} : vector<4x512xf32> to vector<4x256xf32>
    %218 = vector.broadcast %41 : vector<1x256xf32> to vector<4x256xf32>
    %219 = arith.mulf %217, %218 : vector<4x256xf32>
    %c32_107 = arith.constant 32 : index
    %c0_108 = arith.constant 0 : index
    %220 = vector.load %arg9[%c32_107, %c0_108] : memref<72x512xf32, #tpu.memory_space<vmem>>, vector<4x256xf32>
    tpu.vector_store %arg9[%c32_107, %c0_108], %219 {strides = array<i32>} : memref<72x512xf32, #tpu.memory_space<vmem>>, vector<4x256xf32>,
    %c1_109 = arith.constant 1 : index
    %c0_110 = arith.constant 0 : index
    %c0_111 = arith.constant 0 : index
    %221 = vector.load %arg8[%c1_109, %c0_110, %c0_111] : memref<2x8x512xf32, #tpu.memory_space<vmem>>, vector<1x4x512xf32>
    %222 = vector.shape_cast %221 : vector<1x4x512xf32> to vector<4x512xf32>
    %223 = vector.extract_strided_slice %222 {offsets = [0, 111], sizes = [4, 256], strides = [1, 1]} : vector<4x512xf32> to vector<4x256xf32>
    %224 = vector.broadcast %6 : vector<1x256xf32> to vector<4x256xf32>
    %225 = arith.mulf %223, %224 : vector<4x256xf32>
    %c0_112 = arith.constant 0 : index
    %c256_113 = arith.constant 256 : index
    %226 = vector.load %arg9[%c0_112, %c256_113] : memref<72x512xf32, #tpu.memory_space<vmem>>, vector<4x256xf32>
    tpu.vector_store %arg9[%c0_112, %c256_113], %225 {strides = array<i32>} : memref<72x512xf32, #tpu.memory_space<vmem>>, vector<4x256xf32>,
    %227 = vector.extract_strided_slice %222 {offsets = [0, 112], sizes = [4, 256], strides = [1, 1]} : vector<4x512xf32> to vector<4x256xf32>
    %228 = vector.broadcast %11 : vector<1x256xf32> to vector<4x256xf32>
    %229 = arith.mulf %227, %228 : vector<4x256xf32>
    %c4_114 = arith.constant 4 : index
    %c256_115 = arith.constant 256 : index
    %230 = vector.load %arg9[%c4_114, %c256_115] : memref<72x512xf32, #tpu.memory_space<vmem>>, vector<4x256xf32>
    tpu.vector_store %arg9[%c4_114, %c256_115], %229 {strides = array<i32>} : memref<72x512xf32, #tpu.memory_space<vmem>>, vector<4x256xf32>,
    %231 = vector.extract_strided_slice %222 {offsets = [0, 113], sizes = [4, 256], strides = [1, 1]} : vector<4x512xf32> to vector<4x256xf32>
    %232 = vector.broadcast %16 : vector<1x256xf32> to vector<4x256xf32>
    %233 = arith.mulf %231, %232 : vector<4x256xf32>
    %c8_116 = arith.constant 8 : index
    %c256_117 = arith.constant 256 : index
    %234 = vector.load %arg9[%c8_116, %c256_117] : memref<72x512xf32, #tpu.memory_space<vmem>>, vector<4x256xf32>
    tpu.vector_store %arg9[%c8_116, %c256_117], %233 {strides = array<i32>} : memref<72x512xf32, #tpu.memory_space<vmem>>, vector<4x256xf32>,
    %235 = vector.extract_strided_slice %222 {offsets = [0, 127], sizes = [4, 256], strides = [1, 1]} : vector<4x512xf32> to vector<4x256xf32>
    %236 = vector.broadcast %21 : vector<1x256xf32> to vector<4x256xf32>
    %237 = arith.mulf %235, %236 : vector<4x256xf32>
    %c12_118 = arith.constant 12 : index
    %c256_119 = arith.constant 256 : index
    %238 = vector.load %arg9[%c12_118, %c256_119] : memref<72x512xf32, #tpu.memory_space<vmem>>, vector<4x256xf32>
    tpu.vector_store %arg9[%c12_118, %c256_119], %237 {strides = array<i32>} : memref<72x512xf32, #tpu.memory_space<vmem>>, vector<4x256xf32>,
    %239 = vector.extract_strided_slice %222 {offsets = [0, 128], sizes = [4, 256], strides = [1, 1]} : vector<4x512xf32> to vector<4x256xf32>
    %c16_120 = arith.constant 16 : index
    %c256_121 = arith.constant 256 : index
    %240 = vector.load %arg9[%c16_120, %c256_121] : memref<72x512xf32, #tpu.memory_space<vmem>>, vector<4x256xf32>
    tpu.vector_store %arg9[%c16_120, %c256_121], %239 {strides = array<i32>} : memref<72x512xf32, #tpu.memory_space<vmem>>, vector<4x256xf32>,
    %241 = vector.extract_strided_slice %222 {offsets = [0, 129], sizes = [4, 256], strides = [1, 1]} : vector<4x512xf32> to vector<4x256xf32>
    %242 = vector.broadcast %26 : vector<1x256xf32> to vector<4x256xf32>
    %243 = arith.mulf %241, %242 : vector<4x256xf32>
    %c20_122 = arith.constant 20 : index
    %c256_123 = arith.constant 256 : index
    %244 = vector.load %arg9[%c20_122, %c256_123] : memref<72x512xf32, #tpu.memory_space<vmem>>, vector<4x256xf32>
    tpu.vector_store %arg9[%c20_122, %c256_123], %243 {strides = array<i32>} : memref<72x512xf32, #tpu.memory_space<vmem>>, vector<4x256xf32>,
    %245 = vector.extract_strided_slice %222 {offsets = [0, 143], sizes = [4, 256], strides = [1, 1]} : vector<4x512xf32> to vector<4x256xf32>
    %246 = vector.broadcast %31 : vector<1x256xf32> to vector<4x256xf32>
    %247 = arith.mulf %245, %246 : vector<4x256xf32>
    %c24_124 = arith.constant 24 : index
    %c256_125 = arith.constant 256 : index
    %248 = vector.load %arg9[%c24_124, %c256_125] : memref<72x512xf32, #tpu.memory_space<vmem>>, vector<4x256xf32>
    tpu.vector_store %arg9[%c24_124, %c256_125], %247 {strides = array<i32>} : memref<72x512xf32, #tpu.memory_space<vmem>>, vector<4x256xf32>,
    %249 = vector.extract_strided_slice %222 {offsets = [0, 144], sizes = [4, 256], strides = [1, 1]} : vector<4x512xf32> to vector<4x256xf32>
    %250 = vector.broadcast %36 : vector<1x256xf32> to vector<4x256xf32>
    %251 = arith.mulf %249, %250 : vector<4x256xf32>
    %c28_126 = arith.constant 28 : index
    %c256_127 = arith.constant 256 : index
    %252 = vector.load %arg9[%c28_126, %c256_127] : memref<72x512xf32, #tpu.memory_space<vmem>>, vector<4x256xf32>
    tpu.vector_store %arg9[%c28_126, %c256_127], %251 {strides = array<i32>} : memref<72x512xf32, #tpu.memory_space<vmem>>, vector<4x256xf32>,
    %253 = vector.extract_strided_slice %222 {offsets = [0, 145], sizes = [4, 256], strides = [1, 1]} : vector<4x512xf32> to vector<4x256xf32>
    %254 = vector.broadcast %41 : vector<1x256xf32> to vector<4x256xf32>
    %255 = arith.mulf %253, %254 : vector<4x256xf32>
    %c32_128 = arith.constant 32 : index
    %c256_129 = arith.constant 256 : index
    %256 = vector.load %arg9[%c32_128, %c256_129] : memref<72x512xf32, #tpu.memory_space<vmem>>, vector<4x256xf32>
    tpu.vector_store %arg9[%c32_128, %c256_129], %255 {strides = array<i32>} : memref<72x512xf32, #tpu.memory_space<vmem>>, vector<4x256xf32>,
    %c0_130 = arith.constant 0 : index
    %c0_131 = arith.constant 0 : index
    %257 = vector.load %arg4[%c0_130, %c0_131] : memref<4x36xf32, #tpu.memory_space<vmem>>, vector<4x36xf32>
    %c0_132 = arith.constant 0 : index
    %c0_133 = arith.constant 0 : index
    %258 = vector.load %arg9[%c0_132, %c0_133] : memref<72x512xf32, #tpu.memory_space<vmem>>, vector<36x512xf32>
    %cst_134 = arith.constant dense<0.000000e+00> : vector<4x512xf32>
    %259 = tpu.matmul %257, %258, %cst_134 {dimension_numbers = #tpu.dot_dimension_numbers<[1], [0], [0], [1], [0, 0, 1, 1], [], []>} : vector<4x36xf32>, vector<36x512xf32>, vector<4x512xf32> -> vector<4x512xf32>
    %260 = vector.extract_strided_slice %0 {offsets = [12, 0], sizes = [4, 1], strides = [1, 1]} : vector<16x1xf32> to vector<4x1xf32>
    %261 = vector.broadcast %260 : vector<4x1xf32> to vector<4x512xf32>
    %262 = arith.addf %259, %261 : vector<4x512xf32>
    %263 = vector.extract_strided_slice %148 {offsets = [8, 0], sizes = [4, 256], strides = [1, 1]} : vector<12x512xf32> to vector<4x256xf32>
    %264 = vector.extract_strided_slice %262 {offsets = [0, 0], sizes = [4, 256], strides = [1, 1]} : vector<4x512xf32> to vector<4x256xf32>
    %265 = arith.addf %263, %264 : vector<4x256xf32>
    %266 = math.tanh %265 : vector<4x256xf32>
    %267 = arith.mulf %154, %162 : vector<4x256xf32>
    %cst_135 = arith.constant 1.000000e+00 : f32
    %268 = vector.broadcast %cst_135 : f32 to vector<4x256xf32>
    %269 = arith.subf %268, %154 : vector<4x256xf32>
    %270 = arith.mulf %269, %266 : vector<4x256xf32>
    %271 = arith.addf %267, %270 : vector<4x256xf32>
    %c0_136 = arith.constant 0 : index
    %c0_137 = arith.constant 0 : index
    %c0_138 = arith.constant 0 : index
    %272 = vector.load %arg7[%c0_136, %c0_137, %c0_138] : memref<2x4x256xf32, #tpu.memory_space<vmem>>, vector<1x4x256xf32>
    %273 = vector.shape_cast %272 : vector<1x4x256xf32> to vector<4x256xf32>
    %274 = vector.shape_cast %271 : vector<4x256xf32> to vector<1x4x256xf32>
    tpu.vector_store %arg7[%c0_136, %c0_137, %c0_138], %274 {strides = array<i32>} : memref<2x4x256xf32, #tpu.memory_space<vmem>>, vector<1x4x256xf32>,
    %275 = vector.extract_strided_slice %148 {offsets = [8, 256], sizes = [4, 256], strides = [1, 1]} : vector<12x512xf32> to vector<4x256xf32>
    %276 = vector.extract_strided_slice %262 {offsets = [0, 256], sizes = [4, 256], strides = [1, 1]} : vector<4x512xf32> to vector<4x256xf32>
    %277 = arith.addf %275, %276 : vector<4x256xf32>
    %278 = math.tanh %277 : vector<4x256xf32>
    %279 = arith.mulf %172, %180 : vector<4x256xf32>
    %cst_139 = arith.constant 1.000000e+00 : f32
    %280 = vector.broadcast %cst_139 : f32 to vector<4x256xf32>
    %281 = arith.subf %280, %172 : vector<4x256xf32>
    %282 = arith.mulf %281, %278 : vector<4x256xf32>
    %283 = arith.addf %279, %282 : vector<4x256xf32>
    %c1_140 = arith.constant 1 : index
    %c0_141 = arith.constant 0 : index
    %c0_142 = arith.constant 0 : index
    %284 = vector.load %arg7[%c1_140, %c0_141, %c0_142] : memref<2x4x256xf32, #tpu.memory_space<vmem>>, vector<1x4x256xf32>
    %285 = vector.shape_cast %284 : vector<1x4x256xf32> to vector<4x256xf32>
    %286 = vector.shape_cast %283 : vector<4x256xf32> to vector<1x4x256xf32>
    tpu.vector_store %arg7[%c1_140, %c0_141, %c0_142], %286 {strides = array<i32>} : memref<2x4x256xf32, #tpu.memory_space<vmem>>, vector<1x4x256xf32>,
    return
  }
  func.func @transform_0(%arg0: i32) -> (i32, i32, i32) {
    %c0_i32 = arith.constant 0 : i32
    %c0_i32_0 = arith.constant 0 : i32
    %c0_i32_1 = arith.constant 0 : i32
    return %arg0, %c0_i32, %c0_i32_0 : i32, i32, i32
  }
  func.func @transform_1(%arg0: i32) -> (i32, i32, i32) {
    %c0_i32 = arith.constant 0 : i32
    %c0_i32_0 = arith.constant 0 : i32
    %c0_i32_1 = arith.constant 0 : i32
    return %arg0, %c0_i32, %c0_i32_0 : i32, i32, i32
  }
  func.func @transform_2(%arg0: i32) -> (i32, i32) {
    %c0_i32 = arith.constant 0 : i32
    %c0_i32_0 = arith.constant 0 : i32
    %c0_i32_1 = arith.constant 0 : i32
    return %c0_i32, %c0_i32_0 : i32, i32
  }
  func.func @transform_3(%arg0: i32) -> (i32, i32) {
    %c0_i32 = arith.constant 0 : i32
    %c0_i32_0 = arith.constant 0 : i32
    %c0_i32_1 = arith.constant 0 : i32
    return %c0_i32, %c0_i32_0 : i32, i32
  }
  func.func @transform_4(%arg0: i32) -> (i32, i32) {
    %c0_i32 = arith.constant 0 : i32
    %c0_i32_0 = arith.constant 0 : i32
    %c0_i32_1 = arith.constant 0 : i32
    return %c0_i32, %c0_i32_0 : i32, i32
  }
  func.func @transform_5(%arg0: i32) -> (i32, i32) {
    %c0_i32 = arith.constant 0 : i32
    %c0_i32_0 = arith.constant 0 : i32
    %c0_i32_1 = arith.constant 0 : i32
    return %c0_i32, %c0_i32_0 : i32, i32
  }
  func.func @transform_6(%arg0: i32) -> (i32, i32, i32) {
    %c0_i32 = arith.constant 0 : i32
    %c0_i32_0 = arith.constant 0 : i32
    %c0_i32_1 = arith.constant 0 : i32
    return %arg0, %c0_i32, %c0_i32_0 : i32, i32, i32
  }
}

</mosaic_0001>

<bundles_post_ra>
// kernel: conv_gru.1
= control target key start
LH: loop header
LB: loop body
LE: loop exit
PB: predicated region body
PF: predicated region fallthrough
CT: control target
= control target key end

     0   :  { %s1306_s23 = smov 17   ;;  %s1307_s24 = smov 16   ;;  %v1314_v50 = vmov 0.0   ;;  %vm66_vm0 = vcmask 1043456   ;;  %vm106_vm1 = vcmask 908288   ;;  %vm123_vm2 = vcmask 138240   ;;  %s1991_s5 = inlined_call_operand.vmem [shape: s32[1,256], index: 5, kind: input, shape index: {}]   ;;  %s1992_s0 = inlined_call_operand.vmem [shape: f32[2,4,256], index: 0, kind: input, shape index: {}]   ;;  %s1993_s1 = inlined_call_operand.vmem [shape: f32[2,4,256], index: 1, kind: input, shape index: {}]   ;;  %s1994_s4 = inlined_call_operand.vmem [shape: f32[16,1], index: 4, kind: input, shape index: {}]   ;;  %s1995_s2 = inlined_call_operand.vmem [shape: f32[12,72], index: 2, kind: input, shape index: {}]   ;;  %s1996_s3 = inlined_call_operand.vmem [shape: f32[4,36], index: 3, kind: input, shape index: {}]   ;;  %s1997_s6 = inlined_call_operand.vmem [shape: f32[2,4,256], index: 6, kind: output, shape index: {}]  }
   0x1   :  { %v25_v0 = vld [vmem:[%s1991_s5] sm:$0x3]  ;;  %s1308_s5 = smov 15   ;;  %s1309_s25 = smov 1   ;;  %v1244_v44 = vld [vmem:[%s1992_s0 + $0x8] sm:$0xff]  ;;  %73 = vst [vmem:[#allocation2 + $0x20] sm:$0xff] %v1314_v50 }
   0x2   :  { %v46_v1 = vshra.s32 %v25_v0, 8  ;;  %v43_v2 = vshra.s32 %v25_v0, 7  ;;  %v40_v3 = vshra.s32 %v25_v0, 6  ;;  %v37_v12 = vshra.s32 %v25_v0, 5  ;;  %s1310_s26 = smov 127   ;;  %s1311_s27 = smov 113  }
   0x3   :  { %v34_v17 = vshra.s32 %v25_v0, 3  ;;  %v31_v21 = vshra.s32 %v25_v0, 2  ;;  %v28_v28 = vshra.s32 %v25_v0, 1  ;;  %v26_v34 = vand.u32 1, %v25_v0  ;;  %s1312_s28 = smov 112   ;;  %s1313_s29 = smov 111  }
   0x4   :  { %v47_v4 = vand.u32 1, %v46_v1  ;;  %v44_v5 = vand.u32 1, %v43_v2  ;;  %v41_v6 = vand.u32 1, %v40_v3  ;;  %v38_v16 = vand.u32 1, %v37_v12  ;;  %v51_v40 = vld [vmem:[%s1992_s0] sm:$0xff]  ;;  %v1385_v47 = vld [vmem:[%s1993_s1 + $0x8] sm:$0xff] }
   0x5   :  { %v35_v20 = vand.u32 1, %v34_v17  ;;  %v32_v25 = vand.u32 1, %v31_v21  ;;  %v29_v31 = vand.u32 1, %v28_v28  ;;  %v27_v37 = vcvt.s32.f32 %v26_v34  ;;  %54 = vst [vmem:[#allocation1] ss:$2 sm:$0xff] %v51_v40  ;;  %v1376_v41 = vld [vmem:[%s1993_s1] sm:$0xff] }
   0x6   :  { %v48_v7 = vcvt.s32.f32 %v47_v4  ;;  %v45_v8 = vcvt.s32.f32 %v44_v5  ;;  %v42_v9 = vcvt.s32.f32 %v41_v6  ;;  %v39_v19 = vcvt.s32.f32 %v38_v16  ;;  %49 = vst [vmem:[#allocation2 + $0x28] sm:$0xff] %v1314_v50 }
   0x7   :  { %v36_v24 = vcvt.s32.f32 %v35_v20  ;;  %v33_v27 = vcvt.s32.f32 %v32_v25  ;;  %v30_v33 = vcvt.s32.f32 %v29_v31  ;;  %v100_v38 = vperm.slane %v27_v37, 0  ;;  %50 = vst [vmem:[#allocation2] sm:$0xff] %v1314_v50 }
   0x8   :  { %v313_v10 = vperm.slane %v48_v7, 0  ;;  %v284_v11 = vperm.slane %v45_v8, 0  ;;  %v255_v13 = vperm.slane %v42_v9, 0  ;;  %v314_v14 = vperm.slane %v48_v7, 1  ;;  %72 = vst [vmem:[#allocation2 + $0x18] sm:$0xff] %v1314_v50 }
   0x9   :  { %v285_v15 = vperm.slane %v45_v8, 1  ;;  %v256_v18 = vperm.slane %v42_v9, 1  ;;  %v227_v22 = vperm.slane %v39_v19, 1  ;;  %v226_v23 = vperm.slane %v39_v19, 0 }
   0xa   :  { %315 = vrot.lane.b32.xlu0 %v313_v10, %s1306_s23  ;;  %286 = vrot.lane.b32.xlu1 %v284_v11, %s1307_s24  ;;  %v193_v26 = vperm.slane %v36_v24, 0  ;;  %v194_v29 = vperm.slane %v36_v24, 1  ;;  %v162_v30 = vperm.slane %v33_v27, 0  ;;  %v163_v32 = vperm.slane %v33_v27, 1 }
   0xb   :  { %257 = vrot.lane.b32.xlu2 %v255_v13, %s1308_s5  ;;  %v132_v35 = vperm.slane %v30_v33, 1  ;;  %v131_v36 = vperm.slane %v30_v33, 0  ;;  %v101_v39 = vperm.slane %v27_v37, 1  ;;  %vm168_vm3 = vcmask 924672  }
   0xc   :  { %v55_v42 = vld.sshfl [vmem:[#allocation1] sm:$0xff pattern:$0x75316420]  ;;  %v56_v43 = vld.sshfl [vmem:[#allocation1 + $0x8] sm:$0xff pattern:$0x75316420] }
   0xd   :  { %61 = vst [vmem:[#allocation1 + $0x1] ss:$2 sm:$0xff] %v1376_v41  ;;  %v1438_v6 = vld [vmem:[#allocation2 + $0x28] sm:$0xf]  ;;  %vm1998_vm4 = vcmask 130048   ;;  %vm199_vm5 = vcmask 1039360  }
   0xe   :  { %vm185_vm6 = vcmask 121856   ;;  %vm137_vm7 = vcmask 916480   ;;  %vm1999_vm8 = vcmask 7168   ;;  %vm539_vm9 = vcmask 588800  }
  0x12   :  { %317 = vrot.lane.b32.xlu0 %v314_v14, %s1306_s23  ;;  %288 = vrot.lane.b32.xlu1 %v285_v15, %s1307_s24 }
  0x13   :  { %259 = vrot.lane.b32.xlu2 %v256_v18, %s1308_s5 }
  0x14   :  { %v62_v45 = vld.sshfl [vmem:[#allocation1] sm:$0xff pattern:$0x75316420]  ;;  %v63_v46 = vld.sshfl [vmem:[#allocation1 + $0x8] sm:$0xff pattern:$0x75316420] }
  0x15   :  { %79 = vst [vmem:[#allocation1] ss:$2 sm:$0xff] %v1244_v44  ;;  %v1394_v53 = vsel %vm66_vm0, %v55_v42, %v62_v45  ;;  %v1407_v57 = vsel %vm66_vm0, %v56_v43, %v63_v46 }
  0x16   :  { %69 = vst [vmem:[#allocation2 + $0x10] sm:$0xff] %v1394_v53 }
  0x17   :  { %223 = vst [vmem:[#allocation3 + $0x48] sm:$0xff] %v1394_v53 }
  0x18   :  { %70 = vst [vmem:[#allocation2 + $0x8] sm:$0xff] %v1407_v57 }
  0x19   :  { %224 = vst [vmem:[#allocation3 + $0x38] sm:$0xff] %v1407_v57 }
  0x1a   :  { %230 = vrot.lane.b32.xlu1 %v227_v22, %s1309_s25  ;;  %228 = vrot.lane.b32.xlu0 %v226_v23, %s1309_s25 }
  0x1b   :  { %195 = vrot.lane.b32.xlu2 %v193_v26, %s1310_s26 }
  0x1c   :  { %v80_v48 = vld.sshfl [vmem:[#allocation1] sm:$0xff pattern:$0x75316420]  ;;  %v81_v49 = vld.sshfl [vmem:[#allocation1 + $0x8] sm:$0xff pattern:$0x75316420] }
  0x1d   :  { %86 = vst [vmem:[#allocation1 + $0x1] ss:$2 sm:$0xff] %v1385_v47 }
  0x22   :  { %197 = vrot.lane.b32.xlu0 %v194_v29, %s1310_s26  ;;  %164 = vrot.lane.b32.xlu1 %v162_v30, %s1311_s27 }
  0x23   :  { %166 = vrot.lane.b32.xlu2 %v163_v32, %s1311_s27 }
  0x24   :  { %v87_v51 = vld.sshfl [vmem:[#allocation1] sm:$0xff pattern:$0x75316420]  ;;  %v88_v54 = vld.sshfl [vmem:[#allocation1 + $0x8] sm:$0xff pattern:$0x75316420] }
  0x25   :  { %v1389_v52 = vsel %vm66_vm0, %v80_v48, %v87_v51  ;;  %v1399_v55 = vsel %vm66_vm0, %v81_v49, %v88_v54  ;;  %679 = vst [vmem:[#allocation1 + $0x1] ss:$2 sm:$0xff] %v1376_v41  ;;  %v1315_v48 = vmov 0  }
  0x26   :  { %93 = vst [vmem:[#allocation2 + $0x38] sm:$0xff] %v1389_v52  ;;  %1278 = vset.pattern.permute.xlu1 %v1315_v48  ;;  %1279 = vset.pattern.permute.xlu2 %v1315_v48 }
  0x27   :  { %417 = vst [vmem:[#allocation3 + $0x60] sm:$0xff] %v1389_v52  ;;  %1280 = vset.pattern.permute.xlu0 %v1315_v48 }
  0x28   :  { %94 = vst [vmem:[#allocation2 + $0x30] sm:$0xff] %v1399_v55 }
  0x29   :  { %418 = vst [vmem:[#allocation3 + $0x78] sm:$0xff] %v1399_v55 }
  0x2a   :  { %135 = vrot.lane.b32.xlu1 %v132_v35, %s1312_s28  ;;  %133 = vrot.lane.b32.xlu0 %v131_v36, %s1312_s28 }
  0x2b   :  { %102 = vrot.lane.b32.xlu2 %v100_v38, %s1313_s29 }
  0x32   :  { %104 = vrot.lane.b32.xlu0 %v101_v39, %s1313_s29 }
  0x65   :  { %v1402_v56 = vpop.permute.xlu2 %257 }
  0x66   :  { %v437_v30 = vmul.f32 %v1402_v56, %v1389_v52  ;;  %v265_v31 = vmul.f32 %v1402_v56, %v1394_v53 }
  0x6d   :  { %v1411_v58 = vpop.permute.xlu2 %259 }
  0x6e   :  { %v439_v4 = vmul.f32 0.0, %v1411_v58  ;;  %v1562_v43 = vsel %vm185_vm6, %v1402_v56, %v1411_v58 }
  0x6f   :  { %v438_v45 = vmul.f32 %v1562_v43, %v1399_v55 }
  0x75   :  { %v1413_v59 = vpop.permute.xlu2 %195 }
  0x76   :  { %v1442_v7 = vmul.f32 %v1438_v6, %v1413_v59  ;;  %v1459_v14 = vmul.f32 0.0, %v1413_v59 }
  0x7c   :  { %v1415_v60 = vpop.permute.xlu0 %315  ;;  %v1417_v61 = vpop.permute.xlu1 %286 }
  0x7d   :  { %v1419_v62 = vpop.permute.xlu2 %166  ;;  %v323_v20 = vmul.f32 %v1415_v60, %v1394_v53  ;;  %v473_v24 = vmul.f32 %v1415_v60, %v1389_v52  ;;  %v294_v25 = vmul.f32 %v1417_v61, %v1394_v53  ;;  %v455_v26 = vmul.f32 %v1417_v61, %v1389_v52 }
  0x7e   :  { %v383_v23 = vmul.f32 %v1419_v62, %v1399_v55  ;;  %v175_v54 = vmul.f32 %v1419_v62, %v1407_v57 }
  0x84   :  { %v1421_v63 = vpop.permute.xlu0 %317  ;;  %v1423_v0 = vpop.permute.xlu1 %288 }
  0x85   :  { %v457_v1 = vmul.f32 0.0, %v1423_v0  ;;  %v1426_v2 = vpop.permute.xlu2 %102  ;;  %v325_v12 = vmul.f32 0.0, %v1421_v63  ;;  %v1526_v33 = vsel %vm123_vm2, %v1415_v60, %v1421_v63  ;;  %v1543_v37 = vsel %vm1998_vm4, %v1417_v61, %v1423_v0 }
  0x86   :  { %v1430_v3 = vmul.f32 0.0, %v1426_v2  ;;  %v474_v35 = vmul.f32 %v1526_v33, %v1399_v55  ;;  %v456_v39 = vmul.f32 %v1543_v37, %v1399_v55  ;;  %v295_v42 = vmul.f32 %v1543_v37, %v1407_v57 }
  0x87   :  { %465 = vrot.lane.b32.xlu1 %v457_v1, %s1312_s28 }
  0x88   :  { %351 = vrot.lane.b32.xlu2 %v1430_v3, %s1306_s23 }
  0x8c   :  { %v1435_v5 = vpop.permute.xlu0 %228  ;;  %v1444_v8 = vpop.permute.xlu1 %230 }
  0x8d   :  { %v421_v9 = vmul.f32 0.0, %v1444_v8  ;;  %v419_v19 = vmul.f32 %v1435_v5, %v1389_v52  ;;  %v1581_v50 = vsel %vm1999_vm8, %v1435_v5, %v1444_v8 }
  0x8e   :  { %v420_v51 = vmul.f32 %v1581_v50, %v1399_v55 }
  0x8f   :  { %447 = vrot.lane.b32.xlu1 %v439_v4, %s1311_s27 }
  0x94   :  { %v1447_v10 = vpop.permute.xlu0 %197  ;;  %v1483_v21 = vpop.permute.xlu1 %164 }
  0x95   :  { %v1486_v22 = vmul.f32 0.0, %v1483_v21  ;;  %v401_v32 = vmul.f32 %v1447_v10, %v1399_v55  ;;  %v1531_v34 = vsel %vm168_vm3, %v1483_v21, %v1419_v62  ;;  %v1548_v38 = vsel %vm199_vm5, %v1413_v59, %v1447_v10 }
  0x96   :  { %v382_v36 = vmul.f32 %v1531_v34, %v1389_v52  ;;  %v400_v40 = vmul.f32 %v1548_v38, %v1389_v52  ;;  %v205_v46 = vmul.f32 %v1548_v38, %v1394_v53 }
  0x97   :  { %429 = vrot.lane.b32.xlu1 %v421_v9, %s1310_s26 }
  0x9c   :  { %v1450_v11 = vpop.permute.xlu0 %133  ;;  %v1503_v27 = vpop.permute.xlu1 %135 }
  0x9d   :  { %v1456_v13 = vmul.f32 %v1438_v6, %v1450_v11  ;;  %v365_v28 = vmul.f32 %v1503_v27, %v1399_v55  ;;  %v1508_v29 = vmul.f32 0.0, %v1450_v11  ;;  %v1567_v44 = vsel %vm137_vm7, %v1450_v11, %v1503_v27 }
  0x9e   :  { %v364_v49 = vmul.f32 %v1567_v44, %v1389_v52 }
  0x9f   :  { %333 = vrot.lane.b32.xlu1 %v325_v12, %s1313_s29 }
  0xa4   :  { %v1461_v15 = vpop.permute.xlu0 %104 }
  0xa5   :  { %v347_v16 = vmul.f32 %v1461_v15, %v1399_v55  ;;  %v1468_v17 = vsel %vm106_vm1, %v1426_v2, %v1461_v15 }
  0xa6   :  { %v346_v18 = vmul.f32 %v1468_v17, %v1389_v52  ;;  %v112_v48 = vmul.f32 %v1468_v17, %v1394_v53 }
  0xa7   :  { %405 = vrot.lane.b32.xlu1 %v1459_v14, %s1309_s25  ;;  %355 = vrot.lane.b32.xlu0 %v347_v16, %s1306_s23 }
  0xa8   :  { %353 = vrot.lane.b32.xlu2 %v346_v18, %s1306_s23 }
  0xaf   :  { %425 = vrot.lane.b32.xlu0 %v419_v19, %s1310_s26  ;;  %329 = vrot.lane.b32.xlu1 %v323_v20, %s1313_s29  ;;  %v236_v19 = vmul.f32 %v1435_v5, %v1394_v53  ;;  %v113_v20 = vmul.f32 %v1461_v15, %v1407_v57 }
  0xb0   :  { %483 = vrot.lane.b32.xlu2 %v325_v12, %s1313_s29  ;;  %v237_v12 = vmul.f32 %v1581_v50, %v1407_v57 }
  0xb7   :  { %391 = vrot.lane.b32.xlu0 %v383_v23, %s1308_s5  ;;  %387 = vrot.lane.b32.xlu1 %v1486_v22, %s1308_s5  ;;  %v206_v23 = vmul.f32 %v1447_v10, %v1407_v57 }
  0xb8   :  { %479 = vrot.lane.b32.xlu2 %v473_v24, %s1313_s29 }
  0xbf   :  { %304 = vrot.lane.b32.xlu0 %v457_v1, %s1312_s28  ;;  %300 = vrot.lane.b32.xlu1 %v294_v25, %s1312_s28  ;;  %v266_v1 = vmul.f32 %v1562_v43, %v1407_v57 }
  0xc0   :  { %461 = vrot.lane.b32.xlu2 %v455_v26, %s1312_s28 }
  0xc7   :  { %373 = vrot.lane.b32.xlu0 %v365_v28, %s1307_s24  ;;  %369 = vrot.lane.b32.xlu1 %v1508_v29, %s1307_s24  ;;  %v23_v28 = vld [vmem:[%s1994_s4] sm:$0xff] }
  0xc8   :  { %443 = vrot.lane.b32.xlu2 %v437_v30, %s1311_s27  ;;  %v174_v30 = vmul.f32 %v1531_v34, %v1394_v53 }
  0xcf   :  { %275 = vrot.lane.b32.xlu0 %v439_v4, %s1311_s27  ;;  %271 = vrot.lane.b32.xlu1 %v265_v31, %s1311_s27  ;;  %v324_v4 = vmul.f32 %v1526_v33, %v1407_v57  ;;  %v915_v31 = vld [vmem:[#allocation2 + $0x20] sm:$0xf] }
  0xd0   :  { %409 = vrot.lane.b32.xlu2 %v401_v32, %s1309_s25 }
  0xd7   :  { %246 = vrot.lane.b32.xlu0 %v421_v9, %s1310_s26  ;;  %481 = vrot.lane.b32.xlu1 %v474_v35, %s1313_s29  ;;  %v144_v9 = vmul.f32 %v1503_v27, %v1407_v57  ;;  %v1037_v35 = vmul.f32 %v915_v31, %v1423_v0 }
  0xd8   :  { %389 = vrot.lane.b32.xlu2 %v382_v36, %s1308_s5 }
  0xdf   :  { %463 = vrot.lane.b32.xlu0 %v456_v39, %s1312_s28  ;;  %407 = vrot.lane.b32.xlu1 %v400_v40, %s1309_s25  ;;  %v1043_v39 = vrot.slane %v1037_v35, 4  ;;  %v143_v40 = vmul.f32 %v1567_v44, %v1394_v53  ;;  %v912_v35 = vld [vmem:[#allocation2 + $0x18] sm:$0xf] }
  0xe0   :  { %302 = vrot.lane.b32.xlu2 %v295_v42, %s1312_s28 }
  0xe2   :  { %v352_v16 = vpop.permute.xlu2 %351 }
  0xe7   :  { %445 = vrot.lane.b32.xlu0 %v438_v45, %s1311_s27  ;;  %212 = vrot.lane.b32.xlu1 %v205_v46, %s1309_s25 }
  0xe8   :  { %371 = vrot.lane.b32.xlu2 %v364_v49, %s1307_s24 }
  0xef   :  { %427 = vrot.lane.b32.xlu0 %v420_v51, %s1310_s26  ;;  %183 = vrot.lane.b32.xlu1 %v175_v54, %s1308_s5 }
  0xf0   :  { %273 = vrot.lane.b32.xlu2 %v266_v1, %s1311_s27  ;;  %v793_v1 = vmul.f32 %v1438_v6, %v1483_v21 }
  0xf7   :  { %331 = vrot.lane.b32.xlu0 %v324_v4, %s1313_s29  ;;  %152 = vrot.lane.b32.xlu1 %v144_v9, %s1307_s24  ;;  %v1019_v4 = vmul.f32 %v915_v31, %v1411_v58 }
  0xf8   :  { %244 = vrot.lane.b32.xlu2 %v237_v12, %s1310_s26 }
  0xf9   :  { %v1601_v18 = vpop.permute.xlu1 %465 }
  0xff   :  { %242 = vrot.lane.b32.xlu0 %v236_v19, %s1310_s26  ;;  %121 = vrot.lane.b32.xlu1 %v113_v20, %s1306_s23  ;;  %v1058_v19 = vmul.f32 %v915_v31, %v1421_v63 }
 0x100   :  { %214 = vrot.lane.b32.xlu2 %v206_v23, %s1309_s25 }
 0x101   :  { %v1612_v24 = vpop.permute.xlu1 %447 }
 0x102   :  { %v354_v25 = vpop.permute.xlu2 %353 }
 0x103   :  { %v1615_v26 = vsel %vm123_vm2, %v352_v16, %v354_v25  ;;  %v753_v16 = vld [vmem:[#allocation2] sm:$0xf] }
 0x104   :  { %361 = vst [vmem:[#allocation3 + $0x70] sm:$0xff] %v1615_v26  ;;  %v896_v6 = vmul.f32 %v753_v16, %v1421_v63  ;;  %v973_v63 = vmul.f32 %v912_v35, %v1413_v59 }
 0x107   :  { %531 = vperm.xlu1 %1278, %v23_v28   ;;  %181 = vrot.lane.b32.xlu0 %v174_v30, %s1308_s5  ;;  %v857_v28 = vmul.f32 %v753_v16, %v1411_v58  ;;  %v979_v58 = vrot.slane %v973_v63, 4 }
 0x108   :  { %210 = vrot.lane.b32.xlu2 %v1459_v14, %s1309_s25  ;;  %v998_v14 = vmul.f32 %v915_v31, %v1444_v8 }
 0x109   :  { %v1626_v32 = vpop.permute.xlu1 %429 }
 0x10a   :  { %v1629_v36 = vpop.permute.xlu2 %483  ;;  %v1004_v46 = vrot.slane %v998_v14, 4 }
 0x10f   :  { %1048 = vrot.lane.b32.xlu1 %v1043_v39, %s1312_s28  ;;  %150 = vrot.lane.b32.xlu0 %v143_v40, %s1307_s24 }
 0x110   :  { %179 = vrot.lane.b32.xlu2 %v1486_v22, %s1308_s5 }
 0x111   :  { %v1637_v42 = vpop.permute.xlu1 %333 }
 0x112   :  { %v1640_v45 = vpop.permute.xlu2 %479 }
 0x117   :  { %1009 = vrot.lane.b32.xlu1 %v1004_v46, %s1310_s26  ;;  %119 = vrot.lane.b32.xlu0 %v112_v48, %s1306_s23 }
 0x118   :  { %148 = vrot.lane.b32.xlu2 %v1508_v29, %s1307_s24 }
 0x119   :  { %v1648_v49 = vpop.permute.xlu1 %405  ;;  %v356_v22 = vpop.permute.xlu0 %355 }
 0x11a   :  { %v1651_v51 = vsel %vm123_vm2, %v354_v25, %v356_v22  ;;  %v1653_v54 = vpop.permute.xlu2 %461  ;;  %v875_v25 = vmul.f32 %v753_v16, %v1423_v0  ;;  %v955_v0 = vmul.f32 %v912_v35, %v1483_v21  ;;  %v934_v22 = vmul.f32 %v912_v35, %v1450_v11 }
 0x11b   :  { %362 = vst [vmem:[#allocation3 + $0xc8] sm:$0xff] %v1651_v51 }
 0x11c   :  { %v881_v30 = vrot.slane %v875_v25, 4 }
 0x11f   :  { %799 = vrot.lane.b32.xlu1 %v793_v1, %s1308_s5  ;;  %117 = vrot.lane.b32.xlu0 %v1430_v3, %s1306_s23 }
 0x120   :  { %1027 = vrot.lane.b32.xlu2 %v1019_v4, %s1311_s27  ;;  %v836_v4 = vmul.f32 %v753_v16, %v1444_v8  ;;  %v916_v8 = vmul.f32 %v912_v35, %v1426_v2 }
 0x121   :  { %v1663_v29 = vpop.permute.xlu0 %425  ;;  %v1665_v9 = vpop.permute.xlu1 %329 }
 0x122   :  { %v1667_v12 = vpop.permute.xlu2 %443 }
 0x127   :  { %1066 = vrot.lane.b32.xlu0 %v1058_v19, %s1313_s29 }
 0x128   :  { %904 = vrot.lane.b32.xlu2 %v896_v6, %s1313_s29 }
 0x129   :  { %v392_v20 = vpop.permute.xlu0 %391  ;;  %v388_v23 = vpop.permute.xlu1 %387 }
 0x12a   :  { %v410_v3 = vpop.permute.xlu2 %409 }
 0x12f   :  { %865 = vrot.lane.b32.xlu0 %v857_v28, %s1311_s27 }
 0x130   :  { %886 = vrot.lane.b32.xlu2 %v881_v30, %s1312_s28 }
 0x131   :  { %v305_v31 = vpop.permute.xlu0 %304  ;;  %v301_v39 = vpop.permute.xlu1 %300 }
 0x132   :  { %v390_v40 = vpop.permute.xlu2 %389 }
 0x133   :  { %v1679_v14 = vsel %vm185_vm6, %v388_v23, %v390_v40  ;;  %v1682_v46 = vsel %vm185_vm6, %v390_v40, %v392_v20  ;;  %v940_v20 = vrot.slane %v934_v22, 4  ;;  %v842_v23 = vrot.slane %v836_v4, 4 }
 0x134   :  { %397 = vst [vmem:[#allocation3 + $0x58] sm:$0xff] %v1679_v14 }
 0x135   :  { %398 = vst [vmem:[#allocation3 + $0x100] sm:$0xff] %v1682_v46 }
 0x137   :  { %982 = vrot.lane.b32.xlu0 %v979_v58, %s1309_s25 }
 0x138   :  { %961 = vrot.lane.b32.xlu2 %v955_v0, %s1308_s5 }
 0x139   :  { %v374_v48 = vpop.permute.xlu0 %373  ;;  %v370_v59 = vpop.permute.xlu1 %369 }
 0x13a   :  { %v303_v1 = vpop.permute.xlu2 %302 }
 0x13b   :  { %v1692_v19 = vsel %vm137_vm7, %v301_v39, %v303_v1  ;;  %v1695_v6 = vsel %vm137_vm7, %v303_v1, %v305_v31 }
 0x13f   :  { %943 = vrot.lane.b32.xlu0 %v940_v20, %s1307_s24 }
 0x140   :  { %847 = vrot.lane.b32.xlu2 %v842_v23, %s1310_s26 }
 0x141   :  { %v276_v21 = vpop.permute.xlu0 %275  ;;  %v272_v25 = vpop.permute.xlu1 %271 }
 0x142   :  { %v372_v28 = vpop.permute.xlu2 %371 }
 0x143   :  { %v375_v11 = vsel %vm1998_vm4, %v370_v59, %v372_v28  ;;  %v376_v30 = vsel %vm1998_vm4, %v372_v28, %v374_v48 }
 0x144   :  { %379 = vst [vmem:[#allocation3 + $0x30] sm:$0xff] %v375_v11 }
 0x145   :  { %380 = vst [vmem:[#allocation3 + $0xd8] sm:$0xff] %v376_v30 }
 0x148   :  { %922 = vrot.lane.b32.xlu2 %v916_v8, %s1306_s23 }
 0x149   :  { %v247_v16 = vpop.permute.xlu0 %246  ;;  %v482_v31 = vpop.permute.xlu1 %481 }
 0x14a   :  { %v485_v39 = vsel %vm106_vm1, %v1640_v45, %v482_v31  ;;  %v486_v63 = vsel %vm106_vm1, %v482_v31, %v1629_v36  ;;  %v274_v40 = vpop.permute.xlu2 %273 }
 0x14b   :  { %v277_v58 = vsel %vm168_vm3, %v272_v25, %v274_v40  ;;  %v278_v0 = vsel %vm168_vm3, %v274_v40, %v276_v21  ;;  %599 = vmatpush.msra.mxu2 %v485_v39  ;;  %622 = vmatpush.msra.mxu3 %v486_v63  ;;  %v1755_v40 = vld.sshfl [vmem:[#allocation1] sm:$0xff pattern:$0x75316420] }
 0x151   :  { %v464_v48 = vpop.permute.xlu0 %463  ;;  %v408_v59 = vpop.permute.xlu1 %407 }
 0x152   :  { %v467_v35 = vsel %vm137_vm7, %v1653_v54, %v464_v48  ;;  %v468_v22 = vsel %vm137_vm7, %v464_v48, %v1601_v18  ;;  %v411_v45 = vsel %vm1999_vm8, %v1648_v49, %v408_v59  ;;  %v245_v1 = vpop.permute.xlu2 %244  ;;  %v412_v36 = vsel %vm1999_vm8, %v408_v59, %v410_v3 }
 0x153   :  { %600 = vmatpush.msra.mxu2 %v467_v35  ;;  %623 = vmatpush.msra.mxu3 %v468_v22  ;;  %v249_v4 = vsel %vm199_vm5, %v245_v1, %v247_v16  ;;  %415 = vst [vmem:[#allocation3 + $0x88] sm:$0xff] %v411_v45 }
 0x154   :  { %416 = vst [vmem:[#allocation3 + $0x110] sm:$0xff] %v412_v36 }
 0x159   :  { %v446_v20 = vpop.permute.xlu0 %445  ;;  %v213_v23 = vpop.permute.xlu1 %212 }
 0x15a   :  { %v449_v54 = vsel %vm168_vm3, %v1667_v12, %v446_v20  ;;  %v450_v18 = vsel %vm168_vm3, %v446_v20, %v1612_v24  ;;  %v215_v21 = vpop.permute.xlu2 %214 }
 0x15b   :  { %v218_v49 = vsel %vm1999_vm8, %v213_v23, %v215_v21  ;;  %601 = vmatpush.msra.mxu2 %v449_v54  ;;  %624 = vmatpush.msra.mxu3 %v450_v18 }
 0x15c   :  { %222 = vst [vmem:[#allocation3 + $0x90] sm:$0xff] %v218_v49 }
 0x161   :  { %v428_v3 = vpop.permute.xlu0 %427 }
 0x162   :  { %v431_v25 = vsel %vm199_vm5, %v1663_v29, %v428_v3  ;;  %v432_v28 = vsel %vm199_vm5, %v428_v3, %v1626_v32  ;;  %v211_v8 = vpop.permute.xlu2 %210 }
 0x163   :  { %v217_v16 = vsel %vm1999_vm8, %v211_v8, %v213_v23  ;;  %602 = vmatpush.msra.mxu2 %v431_v25  ;;  %625 = vmatpush.msra.mxu3 %v432_v28 }
 0x164   :  { %221 = vst [vmem:[#allocation3 + $0x118] sm:$0xff] %v217_v16 }
 0x165   :  { %603 = vmatpush.msra.mxu2 %v1389_v52  ;;  %626 = vmatpush.msra.mxu3 %v1399_v55  ;;  %v491_v52 = vld [vmem:[%s1995_s2] sm:$0xff] }
 0x167   :  { %604 = vmatpush.msra.mxu2 %v411_v45  ;;  %627 = vmatpush.msra.mxu3 %v412_v36 }
 0x169   :  { %v332_v24 = vpop.permute.xlu0 %331  ;;  %605 = vmatpush.msra.mxu2 %v1679_v14  ;;  %628 = vmatpush.msra.mxu3 %v1682_v46 }
 0x16a   :  { %v335_v32 = vsel %vm106_vm1, %v1665_v9, %v332_v24  ;;  %v336_v29 = vsel %vm106_vm1, %v332_v24, %v1637_v42  ;;  %v184_v9 = vpop.permute.xlu1 %183 }
 0x16b   :  { %553 = vmatpush.msra.mxu0 %v335_v32  ;;  %576 = vmatpush.msra.mxu1 %v336_v29 }
 0x16c   :  { %606 = vmatpush.msra.mxu2 %v375_v11  ;;  %629 = vmatpush.msra.mxu3 %v376_v30 }
 0x16d   :  { %554 = vmatpush.msra.mxu0 %v1692_v19  ;;  %577 = vmatpush.msra.mxu1 %v1695_v6 }
 0x16e   :  { %607 = vmatpush.msra.mxu2 %v1615_v26  ;;  %630 = vmatpush.msra.mxu3 %v1651_v51  ;;  %v180_v26 = vpop.permute.xlu2 %179 }
 0x16f   :  { %1250 = vmatmul.msk.f32.vlgmr.msra.gmra.mxu2 %vm539_vm9, %v491_v52  ;;  %1252 = vmatmul.msk.f32.vlgmr.msra.gmra.mxu3 %vm539_vm9, %v491_v52 }
 0x170   :  { %555 = vmatpush.msra.mxu0 %v277_v58  ;;  %578 = vmatpush.msra.mxu1 %v278_v0  ;;  %v1757_v58 = vld.sshfl [vmem:[#allocation1 + $0x8] sm:$0xff pattern:$0x75316420] }
 0x171   :  { %v243_v55 = vpop.permute.xlu0 %242  ;;  %735 = vst [vmem:[#allocation1 + $0x1] ss:$2 sm:$0xff] %v1385_v47 }
 0x172   :  { %v248_v42 = vsel %vm199_vm5, %v243_v55, %v245_v1  ;;  %579 = vmatpush.msra.mxu1 %v249_v4  ;;  %v153_v46 = vpop.permute.xlu1 %152 }
 0x173   :  { %556 = vmatpush.msra.mxu0 %v248_v42 }
 0x174   :  { %580 = vmatpush.msra.mxu1 %v1407_v57 }
 0x175   :  { %557 = vmatpush.msra.mxu0 %v1394_v53 }
 0x176   :  { %581 = vmatpush.msra.mxu1 %v218_v49  ;;  %v149_v19 = vpop.permute.xlu2 %148 }
 0x177   :  { %558 = vmatpush.msra.mxu0 %v217_v16 }
 0x178   :  { %v736_v0 = vld.sshfl [vmem:[#allocation1] sm:$0xff pattern:$0x75316420]  ;;  %v737_v48 = vld.sshfl [vmem:[#allocation1 + $0x8] sm:$0xff pattern:$0x75316420] }
 0x179   :  { %v182_v51 = vpop.permute.xlu0 %181  ;;  %1197 = vst [vmem:[#allocation1] ss:$2 sm:$0xff] %v1376_v41 }
 0x17a   :  { %v186_v12 = vsel %vm185_vm6, %v180_v26, %v182_v51  ;;  %v187_v14 = vsel %vm185_vm6, %v182_v51, %v184_v9  ;;  %v122_v53 = vpop.permute.xlu1 %121 }
 0x17b   :  { %190 = vst [vmem:[#allocation3 + $0xc0] sm:$0xff] %v186_v12  ;;  %559 = vmatpush.msra.mxu0 %v186_v12  ;;  %582 = vmatpush.msra.mxu1 %v187_v14 }
 0x17c   :  { %191 = vst [vmem:[#allocation3 + $0xb8] sm:$0xff] %v187_v14 }
 0x180   :  { %v1761_v20 = vld.sshfl [vmem:[#allocation1] sm:$0xff pattern:$0x75316420]  ;;  %v1763_v23 = vld.sshfl [vmem:[#allocation1 + $0x8] sm:$0xff pattern:$0x75316420] }
 0x181   :  { %v151_v6 = vpop.permute.xlu0 %150  ;;  %1220 = vst [vmem:[#allocation1] ss:$2 sm:$0xff] %v1385_v47 }
 0x182   :  { %v155_v57 = vsel %vm1998_vm4, %v149_v19, %v151_v6  ;;  %v156_v11 = vsel %vm1998_vm4, %v151_v6, %v153_v46  ;;  %v532_v59 = vpop.permute.xlu1 %531 }
 0x183   :  { %159 = vst [vmem:[#allocation3 + $0x98] sm:$0xff] %v155_v57  ;;  %560 = vmatpush.msra.mxu0 %v155_v57  ;;  %583 = vmatpush.msra.mxu1 %v156_v11 }
 0x184   :  { %160 = vst [vmem:[#allocation3 + $0xb0] sm:$0xff] %v156_v11 }
 0x189   :  { %v120_v30 = vpop.permute.xlu0 %119 }
 0x18a   :  { %v125_v31 = vsel %vm123_vm2, %v120_v30, %v122_v53 }
 0x18b   :  { %129 = vst [vmem:[#allocation3 + $0x28] sm:$0xff] %v125_v31  ;;  %584 = vmatpush.msra.mxu1 %v125_v31 }
 0x18c   :  { %1248 = vmatmul.msk.f32.vlgmr.msra.gmra.mxu1 %vm539_vm9, %v491_v52 }
 0x191   :  { %v118_v39 = vpop.permute.xlu0 %117 }
 0x192   :  { %v124_v63 = vsel %vm123_vm2, %v118_v39, %v120_v30 }
 0x193   :  { %128 = vst [vmem:[#allocation3 + $0xf0] sm:$0xff] %v124_v63  ;;  %561 = vmatpush.msra.mxu0 %v124_v63 }
 0x194   :  { %1246 = vmatmul.msk.f32.vlgmr.msra.gmra.mxu0 %vm539_vm9, %v491_v52 }
 0x1f2   :  { %v609_v35 = vpop.f32.mrf.mxu2  ;;  %v632_v22 = vpop.f32.mrf.mxu3 }
 0x1f3   :  { %v610_v45 = vadd.f32 %v609_v35, %v532_v59  ;;  %v633_v1 = vadd.f32 %v632_v22, %v532_v59 }
 0x1f5   :  { %v1256_v36 = vmul.f32 -1.442695, %v610_v45  ;;  %v1257_v4 = vmul.f32 -1.442695, %v633_v1 }
 0x1f7   :  { %1281 = vpow2.f32 %v1256_v36 }
 0x1f8   :  { %1283 = vpow2.f32 %v1257_v4 }
 0x1fd   :  { %v1282_v54 = vpop.eup %1281 }
 0x1fe   :  { %v1284_v18 = vpop.eup %1283  ;;  %v700_v21 = vadd.f32 1.0, %v1282_v54 }
 0x1ff   :  { %v701_v49 = vadd.f32 1.0, %v1284_v18 }
 0x200   :  { %1285 = vrcp.f32 %v700_v21  ;;  %vm707_vm10 = vweird.f32 %v700_v21  ;;  %v711_v28 = vand.u32 2147483647, %v700_v21  ;;  %v713_v8 = vand.u32 2147483648, %v700_v21 }
 0x201   :  { %1287 = vrcp.f32 %v701_v49  ;;  %vm722_vm12 = vweird.f32 %v701_v49  ;;  %v728_v32 = vand.u32 2147483648, %v701_v49  ;;  %v726_v47 = vand.u32 2147483647, %v701_v49 }
 0x202   :  { %v714_v9 = vor.u32 1.1754944e-38, %v713_v8  ;;  %vm712_vm15 = vcmp.eq.f32.partialorder %v711_v28, 8.507059e+37 }
 0x203   :  { %v729_v14 = vor.u32 1.1754944e-38, %v728_v32  ;;  %vm727_vm8 = vcmp.eq.f32.partialorder %v726_v47, 8.507059e+37 }
 0x206   :  { %v1286_v41 = vpop.eup %1285 }
 0x207   :  { %v1288_v3 = vpop.eup %1287  ;;  %v703_v25 = vmul.f32 %v1286_v41, %v700_v21  ;;  %vm708_vm11 = vweird.f32 %v1286_v41 }
 0x208   :  { %v718_v16 = vmul.f32 %v1288_v3, %v701_v49  ;;  %vm723_vm13 = vweird.f32 %v1288_v3  ;;  %vm709_vm14 = vmor %vm707_vm10, %vm708_vm11 }
 0x209   :  { %v704_v24 = vsub.f32 1.0, %v703_v25  ;;  %v586_v29 = vpop.f32.mrf.mxu1  ;;  %vm724_vm4 = vmor %vm722_vm12, %vm723_vm13 }
 0x20a   :  { %v719_v52 = vsub.f32 1.0, %v718_v16  ;;  %v587_v55 = vadd.f32 %v586_v29, %v532_v59 }
 0x20b   :  { %v705_v42 = vmul.f32 %v1286_v41, %v704_v24 }
 0x20c   :  { %v720_v26 = vmul.f32 %v1288_v3, %v719_v52  ;;  %v1255_v51 = vmul.f32 -1.442695, %v587_v55 }
 0x20d   :  { %v706_v12 = vadd.f32 %v1286_v41, %v705_v42 }
 0x20e   :  { %v721_v46 = vadd.f32 %v1288_v3, %v720_v26  ;;  %1289 = vpow2.f32 %v1255_v51 }
 0x20f   :  { %v710_v19 = vsel %vm709_vm14, %v1286_v41, %v706_v12 }
 0x210   :  { %v1766_v6 = vsel %vm712_vm15, %v714_v9, %v710_v19  ;;  %v725_v57 = vsel %vm724_vm4, %v1288_v3, %v721_v46 }
 0x211   :  { %v740_v11 = vmul.f32 %v736_v0, %v1766_v6  ;;  %v1769_v53 = vsel %vm727_vm8, %v729_v14, %v725_v57  ;;  %v563_v30 = vpop.f32.mrf.mxu0 }
 0x212   :  { %v741_v31 = vmul.f32 %v737_v48, %v1769_v53  ;;  %v564_v39 = vadd.f32 %v563_v30, %v532_v59 }
 0x213   :  { %v744_v63 = vrot.slane %v740_v11, 4 }
 0x214   :  { %v1290_v35 = vpop.eup %1289  ;;  %v745_v22 = vrot.slane %v741_v31, 4  ;;  %v1254_v45 = vmul.f32 -1.442695, %v564_v39 }
 0x215   :  { %748 = vst [vmem:[#allocation2 + $0x38] sm:$0xf] %v744_v63  ;;  %v645_v1 = vadd.f32 1.0, %v1290_v35 }
 0x216   :  { %749 = vst [vmem:[#allocation2 + $0x30] sm:$0xf] %v745_v22  ;;  %1291 = vpow2.f32 %v1254_v45 }
 0x217   :  { %1293 = vrcp.f32 %v645_v1  ;;  %v672_v21 = vand.u32 2147483648, %v645_v1  ;;  %v670_v41 = vand.u32 2147483647, %v645_v1  ;;  %vm666_vm8 = vweird.f32 %v645_v1 }
 0x219   :  { %v673_v28 = vor.u32 1.1754944e-38, %v672_v21  ;;  %vm671_vm11 = vcmp.eq.f32.partialorder %v670_v41, 8.507059e+37 }
 0x21c   :  { %v1292_v36 = vpop.eup %1291  ;;  %v1772_v4 = vld [vmem:[#allocation2 + $0x38] sm:$0xf] }
 0x21d   :  { %v1294_v54 = vpop.eup %1293  ;;  %v644_v0 = vadd.f32 1.0, %v1292_v36  ;;  %v1774_v18 = vld [vmem:[#allocation2 + $0x30] sm:$0xf]  ;;  %994 = vst [vmem:[#allocation3 + $0x58] sm:$0xf] %v1772_v4 }
 0x21e   :  { %v662_v48 = vmul.f32 %v1294_v54, %v645_v1  ;;  %995 = vst [vmem:[#allocation3 + $0x100] sm:$0xf] %v1774_v18  ;;  %vm667_vm4 = vweird.f32 %v1294_v54  ;;  %v1057_v21 = vmul.f32 %v1774_v18, %v1526_v33 }
 0x21f   :  { %1295 = vrcp.f32 %v644_v0  ;;  %vm668_vm10 = vmor %vm666_vm8, %vm667_vm4  ;;  %v657_v47 = vand.u32 2147483648, %v644_v0  ;;  %v655_v9 = vand.u32 2147483647, %v644_v0  ;;  %vm651_vm13 = vweird.f32 %v644_v0 }
 0x220   :  { %v663_v59 = vsub.f32 1.0, %v662_v48 }
 0x221   :  { %v658_v51 = vor.u32 1.1754944e-38, %v657_v47  ;;  %vm656_vm15 = vcmp.eq.f32.partialorder %v655_v9, 8.507059e+37  ;;  %v1017_v47 = vmul.f32 %v1772_v4, %v1402_v56 }
 0x222   :  { %v664_v49 = vmul.f32 %v1294_v54, %v663_v59 }
 0x224   :  { %v665_v3 = vadd.f32 %v1294_v54, %v664_v49 }
 0x225   :  { %v1296_v25 = vpop.eup %1295 }
 0x226   :  { %v669_v8 = vsel %vm668_vm10, %v1294_v54, %v665_v3  ;;  %v647_v16 = vmul.f32 %v1296_v25, %v644_v0  ;;  %vm652_vm12 = vweird.f32 %v1296_v25  ;;  %v1820_v3 = vpop.permute.xlu2 %1027  ;;  %vm1097_vm10 = vcmask 293888  }
 0x227   :  { %v1778_v24 = vsel %vm671_vm11, %v673_v28, %v669_v8  ;;  %vm653_vm14 = vmor %vm651_vm13, %vm652_vm12  ;;  %v1056_v8 = vmul.f32 %v1772_v4, %v1415_v60 }
 0x228   :  { %v685_v32 = vmul.f32 %v1757_v58, %v1778_v24  ;;  %v648_v29 = vsub.f32 1.0, %v647_v16  ;;  %v1784_v52 = vmul.f32 %v1763_v23, %v1778_v24 }
 0x22a   :  { %v689_v55 = vrot.slane %v685_v32, 4  ;;  %v649_v42 = vmul.f32 %v1296_v25, %v648_v29 }
 0x22c   :  { %693 = vst [vmem:[#allocation2 + $0x8] sm:$0xf] %v689_v55  ;;  %v650_v26 = vadd.f32 %v1296_v25, %v649_v42  ;;  %v956_v55 = vmul.f32 %v1772_v4, %v1531_v34 }
 0x22e   :  { %v654_v12 = vsel %vm653_vm14, %v1296_v25, %v650_v26  ;;  %v918_v26 = vmul.f32 %v1774_v18, %v1461_v15 }
 0x22f   :  { %v1786_v14 = vsel %vm656_vm15, %v658_v51, %v654_v12 }
 0x230   :  { %v684_v58 = vmul.f32 %v1755_v40, %v1786_v14  ;;  %v1792_v23 = vmul.f32 %v1761_v20, %v1786_v14 }
 0x232   :  { %v688_v46 = vrot.slane %v684_v58, 4 }
 0x233   :  { %v752_v19 = vld [vmem:[#allocation2 + $0x8] sm:$0xf] }
 0x234   :  { %692 = vst [vmem:[#allocation2 + $0x10] sm:$0xf] %v688_v46  ;;  %v895_v57 = vmul.f32 %v752_v19, %v1526_v33  ;;  %v856_v11 = vmul.f32 %v752_v19, %v1562_v43  ;;  %v795_v31 = vmul.f32 %v752_v19, %v1419_v62  ;;  %v756_v22 = vmul.f32 %v752_v19, %v1461_v15  ;;  %v1832_v33 = vpop.permute.xlu2 %904 }
 0x235   :  { %833 = vst [vmem:[#allocation3 + $0xb8] sm:$0xf] %v752_v19  ;;  %v874_v1 = vmul.f32 %v752_v19, %v1543_v37  ;;  %v835_v59 = vmul.f32 %v752_v19, %v1581_v50  ;;  %v774_v25 = vmul.f32 %v752_v19, %v1503_v27  ;;  %v813_v29 = vmul.f32 %v752_v19, %v1447_v10 }
 0x236   :  { %902 = vrot.lane.b32.xlu1 %v895_v57, %s1313_s29  ;;  %863 = vrot.lane.b32.xlu2 %v856_v11, %s1311_s27  ;;  %v957_v46 = vmul.f32 %v1774_v18, %v1419_v62  ;;  %v975_v62 = vmul.f32 %v1774_v18, %v1447_v10 }
 0x237   :  { %v880_v0 = vrot.slane %v874_v1, 4  ;;  %v841_v41 = vrot.slane %v835_v59, 4  ;;  %v780_v16 = vrot.slane %v774_v25, 4  ;;  %v819_v42 = vrot.slane %v813_v29, 4 }
 0x238   :  { %v981_v11 = vrot.slane %v975_v62, 4 }
 0x23b   :  { %v751_v30 = vld [vmem:[#allocation2 + $0x10] sm:$0xf] }
 0x23c   :  { %v894_v40 = vmul.f32 %v751_v30, %v1415_v60  ;;  %832 = vst [vmem:[#allocation3 + $0xc0] sm:$0xf] %v751_v30  ;;  %v794_v20 = vmul.f32 %v751_v30, %v1531_v34  ;;  %v834_v39 = vmul.f32 %v751_v30, %v1435_v5  ;;  %v855_v63 = vmul.f32 %v751_v30, %v1402_v56  ;;  %v1844_v9 = vpop.permute.xlu2 %886 }
 0x23d   :  { %v773_v45 = vmul.f32 %v751_v30, %v1567_v44  ;;  %v755_v54 = vmul.f32 %v751_v30, %v1468_v17  ;;  %v812_v48 = vmul.f32 %v751_v30, %v1548_v38  ;;  %v873_v28 = vmul.f32 %v751_v30, %v1417_v61  ;;  %v1067_v30 = vpop.permute.xlu0 %1066 }
 0x23e   :  { %803 = vrot.lane.b32.xlu2 %v795_v31, %s1308_s5  ;;  %900 = vrot.lane.b32.xlu0 %v894_v40, %s1313_s29  ;;  %v840_v35 = vrot.slane %v834_v39, 4  ;;  %v1036_v60 = vmul.f32 %v1774_v18, %v1543_v37  ;;  %v1018_v56 = vmul.f32 %v1774_v18, %v1562_v43  ;;  %v974_v34 = vmul.f32 %v1772_v4, %v1548_v38 }
 0x23f   :  { %801 = vrot.lane.b32.xlu1 %v794_v20, %s1308_s5  ;;  %v779_v36 = vrot.slane %v773_v45, 4  ;;  %v818_v49 = vrot.slane %v812_v48, 4  ;;  %v879_v32 = vrot.slane %v873_v28, 4  ;;  %v997_v37 = vmul.f32 %v1774_v18, %v1581_v50  ;;  %v1886_v20 = vpop.permute.xlu1 %1048 }
 0x240   :  { %v1042_v51 = vrot.slane %v1036_v60, 4  ;;  %v980_v58 = vrot.slane %v974_v34, 4  ;;  %v1035_v43 = vmul.f32 %v1772_v4, %v1417_v61  ;;  %v817_v38 = vrot.slane %v1442_v7, 4  ;;  %v492_v60 = vld [vmem:[%s1995_s2 + $0x8] sm:$0xf] }
 0x241   :  { %v1003_v15 = vrot.slane %v997_v37, 4  ;;  %v917_v50 = vmul.f32 %v1772_v4, %v1468_v17  ;;  %v996_v61 = vmul.f32 %v1772_v4, %v1435_v5  ;;  %v935_v31 = vmul.f32 %v1772_v4, %v1567_v44  ;;  %1249 = vmatmul.msk.f32.gmra.mxu1 %vm539_vm9, %v492_v60  ;;  %1251 = vmatmul.msk.f32.gmra.mxu2 %vm539_vm9, %v492_v60 }
 0x242   :  { %v1041_v19 = vrot.slane %v1035_v43, 4  ;;  %v936_v40 = vmul.f32 %v1774_v18, %v1503_v27  ;;  %v778_v44 = vrot.slane %v1456_v13, 4  ;;  %1253 = vmatmul.msk.f32.gmra.mxu3 %vm539_vm9, %v492_v60  ;;  %1247 = vmatmul.msk.f32.gmra.mxu0 %vm539_vm9, %v492_v60  ;;  %vm2001_vm9 = vcmask 130048  }
 0x243   :  { %v1002_v7 = vrot.slane %v996_v61, 4  ;;  %v941_v10 = vrot.slane %v935_v31, 4 }
 0x244   :  { %v1857_v12 = vpop.permute.xlu2 %961  ;;  %v942_v39 = vrot.slane %v936_v40, 4 }
 0x245   :  { %v866_v5 = vpop.permute.xlu0 %865 }
 0x246   :  { %861 = vrot.lane.b32.xlu0 %v855_v63, %s1311_s27  ;;  %843 = vrot.lane.b32.xlu2 %v840_v35, %s1310_s26 }
 0x247   :  { %764 = vrot.lane.b32.xlu1 %v756_v22, %s1306_s23  ;;  %v1305_v22 = vld [vmem:[#allocation2 + $0x28] sm:$0xf]  ;;  %v1893_v4 = vpop.permute.xlu1 %1009 }
 0x248   :  { %v754_v45 = vmul.f32 %v1305_v22, %v1426_v2 }
 0x24c   :  { %v1869_v57 = vpop.permute.xlu2 %847 }
 0x24d   :  { %v983_v18 = vpop.permute.xlu0 %982 }
 0x24e   :  { %783 = vrot.lane.b32.xlu2 %v779_v36, %s1307_s24  ;;  %762 = vrot.lane.b32.xlu0 %v755_v54, %s1306_s23 }
 0x24f   :  { %884 = vrot.lane.b32.xlu1 %v880_v0, %s1312_s28  ;;  %v800_v1 = vpop.permute.xlu1 %799 }
 0x254   :  { %v1880_v17 = vpop.permute.xlu2 %922 }
 0x255   :  { %v1897_v54 = vpop.permute.xlu0 %943 }
 0x256   :  { %1064 = vrot.lane.b32.xlu2 %v1057_v21, %s1313_s29  ;;  %822 = vrot.lane.b32.xlu0 %v818_v49, %s1309_s25 }
 0x257   :  { %845 = vrot.lane.b32.xlu1 %v841_v41, %s1310_s26 }
 0x25e   :  { %1062 = vrot.lane.b32.xlu2 %v1056_v8, %s1313_s29  ;;  %785 = vrot.lane.b32.xlu0 %v780_v16, %s1307_s24 }
 0x25f   :  { %882 = vrot.lane.b32.xlu1 %v879_v32, %s1312_s28 }
 0x266   :  { %1023 = vrot.lane.b32.xlu2 %v1017_v47, %s1311_s27  ;;  %963 = vrot.lane.b32.xlu0 %v956_v55, %s1308_s5 }
 0x267   :  { %824 = vrot.lane.b32.xlu1 %v819_v42, %s1309_s25 }
 0x26e   :  { %926 = vrot.lane.b32.xlu2 %v918_v26, %s1306_s23  ;;  %1046 = vrot.lane.b32.xlu0 %v1042_v51, %s1312_s28 }
 0x26f   :  { %1025 = vrot.lane.b32.xlu1 %v1018_v56, %s1311_s27 }
 0x276   :  { %984 = vrot.lane.b32.xlu2 %v980_v58, %s1309_s25  ;;  %1007 = vrot.lane.b32.xlu0 %v1003_v15, %s1310_s26 }
 0x277   :  { %965 = vrot.lane.b32.xlu1 %v957_v46, %s1308_s5 }
 0x27e   :  { %820 = vrot.lane.b32.xlu2 %v817_v38, %s1309_s25  ;;  %1044 = vrot.lane.b32.xlu0 %v1041_v19, %s1312_s28 }
 0x27f   :  { %924 = vrot.lane.b32.xlu1 %v917_v50, %s1306_s23 }
 0x286   :  { %986 = vrot.lane.b32.xlu0 %v981_v11, %s1309_s25 }
 0x287   :  { %1005 = vrot.lane.b32.xlu1 %v1002_v7, %s1310_s26 }
 0x28e   :  { %945 = vrot.lane.b32.xlu0 %v941_v10, %s1307_s24 }
 0x28f   :  { %947 = vrot.lane.b32.xlu1 %v942_v39, %s1307_s24 }
 0x290   :  { %v864_v63 = vpop.permute.xlu2 %863 }
 0x291   :  { %v868_v35 = vsel %vm168_vm3, %v864_v63, %v866_v5 }
 0x292   :  { %872 = vst [vmem:[#allocation3 + $0x90] sm:$0xf] %v868_v35 }
 0x296   :  { %760 = vrot.lane.b32.xlu0 %v754_v45, %s1306_s23 }
 0x297   :  { %781 = vrot.lane.b32.xlu1 %v778_v44, %s1307_s24 }
 0x298   :  { %v804_v27 = vpop.permute.xlu2 %803 }
 0x2a0   :  { %v844_v36 = vpop.permute.xlu2 %843 }
 0x2a8   :  { %v903_v0 = vpop.permute.xlu1 %902  ;;  %v1899_v48 = vpop.permute.xlu2 %783 }
 0x2a9   :  { %v907_v2 = vsel %vm106_vm1, %v903_v0, %v1832_v33 }
 0x2aa   :  { %911 = vst [vmem:[#allocation3 + $0x38] sm:$0xf] %v907_v2 }
 0x2b0   :  { %v1065_v13 = vpop.permute.xlu2 %1064  ;;  %v901_v59 = vpop.permute.xlu0 %900 }
 0x2b1   :  { %v802_v21 = vpop.permute.xlu1 %801  ;;  %v1069_v49 = vsel %vm106_vm1, %v1065_v13, %v1067_v30  ;;  %v1092_v41 = vld [vmem:[#allocation3 + $0x38] sm:$0xf]  ;;  %v906_v8 = vsel %vm106_vm1, %v901_v59, %v903_v0 }
 0x2b2   :  { %v805_v25 = vsel %vm185_vm6, %v800_v1, %v802_v21  ;;  %v806_v28 = vsel %vm185_vm6, %v802_v21, %v804_v27  ;;  %1073 = vst [vmem:[#allocation3 + $0x78] sm:$0xf] %v1069_v49  ;;  %1261 = vmatpush.msk.msrb.mxu1 %vm66_vm0, %v1092_v41  ;;  %v1074_v0 = vld [vmem:[%s1996_s3] sm:$0xf] }
 0x2b3   :  { %809 = vst [vmem:[#allocation3 + $0x98] sm:$0xf] %v805_v25 }
 0x2b4   :  { %810 = vst [vmem:[#allocation3 + $0xb0] sm:$0xf] %v806_v28 }
 0x2b5   :  { %910 = vst [vmem:[#allocation3 + $0x48] sm:$0xf] %v906_v8 }
 0x2b8   :  { %v1063_v16 = vpop.permute.xlu2 %1062  ;;  %v862_v32 = vpop.permute.xlu0 %861 }
 0x2b9   :  { %v765_v33 = vpop.permute.xlu1 %764  ;;  %v1068_v29 = vsel %vm106_vm1, %v1063_v16, %v1065_v13  ;;  %v867_v47 = vsel %vm168_vm3, %v862_v32, %v864_v63  ;;  %v1094_v55 = vld [vmem:[#allocation3 + $0x78] sm:$0xf]  ;;  %vm2000_vm1 = vcmask 7168  }
 0x2ba   :  { %1072 = vst [vmem:[#allocation3 + $0x60] sm:$0xf] %v1068_v29  ;;  %1265 = vmatpush.msk.msrb.mxu3 %vm66_vm0, %v1094_v55  ;;  %vm2002_vm4 = vmmov %vm2000_vm1 }
 0x2bb   :  { %871 = vst [vmem:[#allocation3 + $0x118] sm:$0xf] %v867_v47  ;;  %vm2003_vm8 = vmmov %vm2000_vm1 }
 0x2bc   :  { %v1091_v42 = vld [vmem:[#allocation3 + $0x48] sm:$0xf] }
 0x2bd   :  { %1259 = vmatpush.msk.msrb.mxu0 %vm66_vm0, %v1091_v42 }
 0x2c0   :  { %v1024_v26 = vpop.permute.xlu2 %1023  ;;  %v1919_v51 = vpop.permute.xlu0 %762 }
 0x2c1   :  { %v885_v56 = vpop.permute.xlu1 %884  ;;  %v767_v34 = vsel %vm123_vm2, %v1919_v51, %v765_v33  ;;  %v1093_v37 = vld [vmem:[#allocation3 + $0x60] sm:$0xf] }
 0x2c2   :  { %v889_v58 = vsel %vm137_vm7, %v885_v56, %v1844_v9  ;;  %771 = vst [vmem:[#allocation3 + $0x28] sm:$0xf] %v767_v34  ;;  %1263 = vmatpush.msk.msrb.mxu2 %vm66_vm0, %v1093_v37 }
 0x2c3   :  { %893 = vst [vmem:[#allocation3 + $0x90] sm:$0xf0] %v889_v58 }
 0x2c8   :  { %v1926_v15 = vpop.permute.xlu2 %926  ;;  %v823_v46 = vpop.permute.xlu0 %822 }
 0x2c9   :  { %v846_v43 = vpop.permute.xlu1 %845 }
 0x2ca   :  { %v849_v38 = vsel %vm199_vm5, %v844_v36, %v846_v43  ;;  %v850_v19 = vsel %vm199_vm5, %v846_v43, %v1869_v57  ;;  %v1088_v50 = vld [vmem:[#allocation3 + $0x90] sm:$0xff] }
 0x2cb   :  { %853 = vst [vmem:[#allocation3 + $0xc0] sm:$0xf0] %v849_v38  ;;  %1145 = vmatpush.msrb.mxu1 %v1088_v50  ;;  %v589_v50 = vpop.f32.mrf.mxu1 }
 0x2cc   :  { %854 = vst [vmem:[#allocation3 + $0xb8] sm:$0xf0] %v850_v19 }
 0x2d0   :  { %v1931_v62 = vpop.permute.xlu2 %984  ;;  %v786_v9 = vpop.permute.xlu0 %785 }
 0x2d1   :  { %v883_v61 = vpop.permute.xlu1 %882  ;;  %v988_v11 = vsel %vm2000_vm1, %v983_v18, %v1931_v62  ;;  %v788_v7 = vsel %vm2001_vm9, %v1899_v48, %v786_v9 }
 0x2d2   :  { %v888_v30 = vsel %vm137_vm7, %v883_v61, %v885_v56  ;;  %992 = vst [vmem:[#allocation3 + $0x30] sm:$0xf0] %v988_v11  ;;  %v1083_v22 = vld [vmem:[#allocation3 + $0xc0] sm:$0xff] }
 0x2d3   :  { %892 = vst [vmem:[#allocation3 + $0x118] sm:$0xf0] %v888_v30  ;;  %v1084_v31 = vld [vmem:[#allocation3 + $0xb8] sm:$0xff] }
 0x2d4   :  { %792 = vst [vmem:[#allocation3 + $0x28] sm:$0xf0] %v788_v7  ;;  %1146 = vmatpush.msrb.mxu1 %v1084_v31  ;;  %v1205_v7 = vsub.f32 1.0, %v1778_v24 }
 0x2d8   :  { %v821_v57 = vpop.permute.xlu2 %820  ;;  %v964_v40 = vpop.permute.xlu0 %963 }
 0x2d9   :  { %v825_v10 = vpop.permute.xlu1 %824  ;;  %v826_v39 = vsel %vm2002_vm4, %v821_v57, %v823_v46  ;;  %v967_v5 = vsel %vm185_vm6, %v1857_v12, %v964_v40 }
 0x2da   :  { %v827_v63 = vsel %vm2003_vm8, %v823_v46, %v825_v10  ;;  %830 = vst [vmem:[#allocation3 + $0x98] sm:$0xf0] %v826_v39  ;;  %v1087_v35 = vld [vmem:[#allocation3 + $0x118] sm:$0xff]  ;;  %v635_v10 = vpop.f32.mrf.mxu3  ;;  %v566_v39 = vpop.f32.mrf.mxu0 }
 0x2db   :  { %831 = vst [vmem:[#allocation3 + $0xb0] sm:$0xf0] %v827_v63  ;;  %1125 = vmatpush.msrb.mxu0 %v1087_v35  ;;  %v1076_v2 = vld [vmem:[#allocation3 + $0x28] sm:$0xff] }
 0x2dc   :  { %971 = vst [vmem:[#allocation3 + $0x30] sm:$0xf] %v967_v5 }
 0x2dd   :  { %1126 = vmatpush.msrb.mxu0 %v1083_v22 }
 0x2e0   :  { %v1047_v45 = vpop.permute.xlu0 %1046 }
 0x2e1   :  { %v1026_v44 = vpop.permute.xlu1 %1025  ;;  %v1051_v27 = vsel %vm137_vm7, %v1047_v45, %v1886_v20  ;;  %v1079_v18 = vld [vmem:[#allocation3 + $0x98] sm:$0xff]  ;;  %v24_v20 = vld [vmem:[%s1994_s4 + $0x8] sm:$0xff] }
 0x2e2   :  { %v1029_v1 = vsel %vm168_vm3, %v1024_v26, %v1026_v44  ;;  %v1030_v12 = vsel %vm168_vm3, %v1026_v44, %v1820_v3  ;;  %1055 = vst [vmem:[#allocation3 + $0x110] sm:$0xf0] %v1051_v27  ;;  %1127 = vmatpush.msrb.mxu0 %v1079_v18  ;;  %v1080_v36 = vld [vmem:[#allocation3 + $0xb0] sm:$0xff]  ;;  %536 = vperm.xlu2 %1279, %v24_v20   ;;  %vm2004_vm3 = vmmov %vm2000_vm1  ;;  %v1228_v20 = vsub.f32 1.0, %v1769_v53 }
 0x2e3   :  { %1033 = vst [vmem:[#allocation3 + $0x88] sm:$0xf] %v1029_v1  ;;  %1147 = vmatpush.msrb.mxu1 %v1080_v36  ;;  %v1081_v37 = vld [vmem:[#allocation3 + $0x30] sm:$0xff] }
 0x2e4   :  { %1034 = vst [vmem:[#allocation3 + $0x110] sm:$0xf] %v1030_v12 }
 0x2e5   :  { %1148 = vmatpush.msrb.mxu1 %v1076_v2  ;;  %v1227_v2 = vsub.f32 1.0, %v1766_v6 }
 0x2e6   :  { %1262 = vmatmul.msk.f32.vlgmr.msrb.gmra.mxu1 %vm1097_vm10, %v1074_v0 }
 0x2e8   :  { %v1008_v3 = vpop.permute.xlu0 %1007 }
 0x2e9   :  { %v966_v13 = vpop.permute.xlu1 %965  ;;  %v1012_v59 = vsel %vm199_vm5, %v1008_v3, %v1893_v4 }
 0x2ea   :  { %v968_v21 = vsel %vm185_vm6, %v964_v40, %v966_v13  ;;  %1016 = vst [vmem:[#allocation3 + $0x100] sm:$0xf0] %v1012_v59  ;;  %vm2005_vm6 = vmmov %vm2001_vm9  ;;  %v612_v40 = vpop.f32.mrf.mxu2  ;;  %v1221_v13 = vld.sshfl [vmem:[#allocation1] sm:$0xff pattern:$0x75316420] }
 0x2eb   :  { %972 = vst [vmem:[#allocation3 + $0xd8] sm:$0xf] %v968_v21  ;;  %v1090_v49 = vld [vmem:[#allocation3 + $0x110] sm:$0xff] }
 0x2ec   :  { %1185 = vmatpush.msrb.mxu3 %v1090_v49 }
 0x2f0   :  { %v1045_v41 = vpop.permute.xlu0 %1044 }
 0x2f1   :  { %v925_v25 = vpop.permute.xlu1 %924  ;;  %v1050_v28 = vsel %vm137_vm7, %v1045_v41, %v1047_v45  ;;  %v1086_v8 = vld [vmem:[#allocation3 + $0x100] sm:$0xff]  ;;  %vm2006_vm7 = vmmov %vm2005_vm6  ;;  %v1204_v41 = vsub.f32 1.0, %v1786_v14 }
 0x2f2   :  { %v928_v16 = vsel %vm123_vm2, %v1880_v17, %v925_v25  ;;  %v929_v32 = vsel %vm123_vm2, %v925_v25, %v1926_v15  ;;  %1054 = vst [vmem:[#allocation3 + $0x88] sm:$0xf0] %v1050_v28  ;;  %1186 = vmatpush.msrb.mxu3 %v1086_v8  ;;  %v1225_v28 = vmul.f32 %v1221_v13, %v1766_v6 }
 0x2f3   :  { %932 = vst [vmem:[#allocation3 + $0x70] sm:$0xf] %v928_v16 }
 0x2f4   :  { %933 = vst [vmem:[#allocation3 + $0xc8] sm:$0xf] %v929_v32 }
 0x2f8   :  { %v987_v4 = vpop.permute.xlu0 %986 }
 0x2f9   :  { %v1006_v33 = vpop.permute.xlu1 %1005  ;;  %v989_v29 = vsel %vm2004_vm3, %v1931_v62, %v987_v4  ;;  %v1089_v47 = vld [vmem:[#allocation3 + $0x88] sm:$0xff] }
 0x2fa   :  { %v1011_v55 = vsel %vm199_vm5, %v1006_v33, %v1008_v3  ;;  %993 = vst [vmem:[#allocation3 + $0xd8] sm:$0xf0] %v989_v29  ;;  %1165 = vmatpush.msrb.mxu2 %v1089_v47  ;;  %vm2007_vm5 = vmmov %vm2005_vm6 }
 0x2fb   :  { %1015 = vst [vmem:[#allocation3 + $0x58] sm:$0xf0] %v1011_v55 }
 0x300   :  { %v946_v42 = vpop.permute.xlu0 %945 }
 0x301   :  { %v948_v17 = vpop.permute.xlu1 %947  ;;  %v949_v60 = vsel %vm2005_vm6, %v1897_v54, %v946_v42  ;;  %v1082_v26 = vld [vmem:[#allocation3 + $0xd8] sm:$0xff] }
 0x302   :  { %v950_v56 = vsel %vm2006_vm7, %v946_v42, %v948_v17  ;;  %953 = vst [vmem:[#allocation3 + $0x70] sm:$0xf0] %v949_v60  ;;  %v1085_v34 = vld [vmem:[#allocation3 + $0x58] sm:$0xff]  ;;  %1187 = vmatpush.msrb.mxu3 %v1082_v26 }
 0x303   :  { %954 = vst [vmem:[#allocation3 + $0xc8] sm:$0xf0] %v950_v56  ;;  %1166 = vmatpush.msrb.mxu2 %v1085_v34 }
 0x305   :  { %1167 = vmatpush.msrb.mxu2 %v1081_v37 }
 0x308   :  { %v761_v58 = vpop.permute.xlu0 %760 }
 0x309   :  { %v782_v15 = vpop.permute.xlu1 %781  ;;  %v766_v46 = vsel %vm123_vm2, %v761_v58, %v1919_v51  ;;  %v1077_v43 = vld [vmem:[#allocation3 + $0x70] sm:$0xff] }
 0x30a   :  { %v787_v38 = vsel %vm2007_vm5, %v782_v15, %v1899_v48  ;;  %770 = vst [vmem:[#allocation3 + $0xf0] sm:$0xf] %v766_v46  ;;  %1168 = vmatpush.msrb.mxu2 %v1077_v43  ;;  %v1078_v54 = vld [vmem:[#allocation3 + $0xc8] sm:$0xff] }
 0x30b   :  { %791 = vst [vmem:[#allocation3 + $0xf0] sm:$0xf0] %v787_v38  ;;  %1188 = vmatpush.msrb.mxu3 %v1078_v54  ;;  %1264 = vmatmul.msk.f32.vlgmr.msrb.gmra.mxu2 %vm1097_vm10, %v1074_v0 }
 0x30c   :  { %1266 = vmatmul.msk.f32.vlgmr.msrb.gmra.mxu3 %vm1097_vm10, %v1074_v0 }
 0x312   :  { %v1075_v19 = vld [vmem:[#allocation3 + $0xf0] sm:$0xff] }
 0x313   :  { %1128 = vmatpush.msrb.mxu0 %v1075_v19 }
 0x314   :  { %1260 = vmatmul.msk.f32.vlgmr.msrb.gmra.mxu0 %vm1097_vm10, %v1074_v0  ;;  %v1222_v0 = vld.sshfl [vmem:[#allocation1 + $0x8] sm:$0xff pattern:$0x75316420] }
 0x315   :  { %v1226_v21 = vmul.f32 %v1222_v0, %v1769_v53 }
 0x33c   :  { %v537_v62 = vpop.permute.xlu2 %536 }
 0x33d   :  { %v1095_v51 = vrot.slane %v537_v62, 4  ;;  %v590_v9 = vadd.f32 %v589_v50, %v537_v62  ;;  %v613_v63 = vadd.f32 %v612_v40, %v537_v62  ;;  %v636_v45 = vadd.f32 %v635_v10, %v537_v62 }
 0x33e   :  { %v567_v1 = vadd.f32 %v566_v39, %v537_v62 }
 0x363   :  { %v1150_v61 = vpop.f32.mrf.mxu1 }
 0x364   :  { %v1151_v11 = vadd.f32 %v1150_v61, %v1095_v51 }
 0x366   :  { %v1194_v48 = vadd.f32 %v1151_v11, %v590_v9 }
 0x368   :  { %1297 = vtanh.f32 %v1194_v48 }
 0x36e   :  { %v1298_v30 = vpop.eup %1297 }
 0x36f   :  { %v1207_v31 = vmul.f32 %v1298_v30, %v1205_v7 }
 0x371   :  { %v1209_v57 = vadd.f32 %v1207_v31, %v1784_v52 }
 0x373   :  { %v1212_v32 = vrot.slane %v1209_v57, 4 }
 0x38e   :  { %v1170_v5 = vpop.f32.mrf.mxu2 }
 0x38f   :  { %v1171_v35 = vadd.f32 %v1170_v5, %v1095_v51  ;;  %v1190_v22 = vpop.f32.mrf.mxu3 }
 0x390   :  { %v1191_v44 = vadd.f32 %v1190_v22, %v1095_v51 }
 0x391   :  { %v1216_v27 = vadd.f32 %v1171_v35, %v613_v63  ;;  %v1130_v18 = vpop.f32.mrf.mxu0 }
 0x392   :  { %v1217_v12 = vadd.f32 %v1191_v44, %v636_v45  ;;  %v1131_v36 = vadd.f32 %v1130_v18, %v1095_v51 }
 0x393   :  { %1299 = vtanh.f32 %v1216_v27 }
 0x394   :  { %1301 = vtanh.f32 %v1217_v12  ;;  %v1193_v24 = vadd.f32 %v1131_v36, %v567_v1 }
 0x396   :  { %1303 = vtanh.f32 %v1193_v24 }
 0x399   :  { %v1300_v52 = vpop.eup %1299 }
 0x39a   :  { %v1302_v3 = vpop.eup %1301  ;;  %v1229_v59 = vmul.f32 %v1300_v52, %v1227_v2 }
 0x39b   :  { %v1230_v49 = vmul.f32 %v1302_v3, %v1228_v20 }
 0x39c   :  { %v1304_v25 = vpop.eup %1303  ;;  %v1231_v4 = vadd.f32 %v1229_v59, %v1225_v28 }
 0x39d   :  { %v1232_v8 = vadd.f32 %v1230_v49, %v1226_v21  ;;  %v1206_v16 = vmul.f32 %v1304_v25, %v1204_v41 }
 0x39f   :  { %v1235_v33 = vrot.slane %v1232_v8, 4  ;;  %v1208_v29 = vadd.f32 %v1206_v16, %v1792_v23 }
 0x3a1   :  { %v1236_v47 = vsel %vm66_vm0, %v1231_v4, %v1235_v33  ;;  %v1213_v55 = vsel %vm66_vm0, %v1208_v29, %v1212_v32 }
 0x3a2   :  { %1267 = vst [vmem:[%s1997_s6 + $0x8] sm:$0xff] %v1236_v47 }
 0x3a3   :  { %1215 = vst [vmem:[%s1997_s6] sm:$0xff] %v1213_v55 }

</bundles_post_ra>
